<compile_context>
chip_gen: v7x
topology: tpu7x:2x2x1
jax: 0.10.0
libtpu: 0.0.40
codegen_flags: <defaults>
</compile_context>

<pallas_src>
import functools

import jax
import jax.numpy as jnp
from jax.experimental import pallas as pl
from jax.experimental.pallas import tpu as pltpu

LOG_STD_MIN = -20.0
LOG_STD_MAX = 2.0


# ----------------------------------------------------------------------------
# Host glue: conv1 im2col on the raw input, rows ordered for in-kernel reuse.
#
# Row index = b*81 + q*9 + r, where
#   q = conv2 kernel element (i2*3 + j2),   i2, j2 in 0..2
#   r = conv2 output position (oh2*3 + ow2) == conv3 patch element, oh2, ow2 in 0..2
# The conv1 output needed for (q, r) sits at spatial (2*oh2+i2, 2*ow2+j2); its conv1
# receptive field in the input is state[:, :, 2h:2h+5, 2w:2w+5].
# (conv2 column 3 / row 3 and trailing input rows never reach the 1x1 conv3 output,
#  exactly as in the PyTorch model, so they are skipped.)
# ----------------------------------------------------------------------------
def build_conv1_patches(state):
    B = state.shape[0]
    x = state[:, 0]                                    # (B, H, W), Cin = 1
    rows = []
    for q in range(9):
        i2, j2 = divmod(q, 3)
        for r in range(9):
            oh2, ow2 = divmod(r, 3)
            h1 = 2 * oh2 + i2                          # conv1 output position
            w1 = 2 * ow2 + j2
            rows.append(x[:, 2 * h1:2 * h1 + 5, 2 * w1:2 * w1 + 5].reshape(B, 25))
    p1 = jnp.stack(rows, axis=1)                       # (B, 81, 25)
    p1 = jnp.pad(p1, ((0, 0), (0, 0), (0, 7)))         # K: 25 -> 32 (zero lanes)
    return p1.reshape(B * 81, 32).astype(jnp.bfloat16)


# ----------------------------------------------------------------------------
# The fused kernel
# ----------------------------------------------------------------------------
def _fused_forward_kernel(
    p1_ref, w1_ref, b1_ref, w2_ref, b2_ref, w3_ref, b3_ref,
    wf1_ref, bf1_ref, wf2_ref, bf2_ref,
    whead_ref, bhead_ref, w1d_ref, w2m_ref, b2m_ref,
    out_ref,
    a1_ref, p2_ref, a2_ref, p3_ref,
    *, B,
):
    f32 = jnp.float32
    bf16 = jnp.bfloat16

    # ---- conv1: (B*81, 32) @ (32, 16), bf16 -> f32 acc, ReLU -------------------------
    a1 = jnp.dot(p1_ref[...], w1_ref[...], preferred_element_type=f32) + b1_ref[...]
    a1 = jnp.maximum(a1, 0.0)
    a1_ref[...] = a1.astype(bf16)

    # ---- assemble conv2 patches: p2[b*9 + r, q*16 + c] = a1[b*81 + q*9 + r, c] -------
    # Contiguous (9, 16) copies only (18 total), thanks to the pre-ordered conv1 rows.
    for b in range(B):
        for q in range(9):
            p2_ref[pl.ds(b * 9, 9), pl.ds(q * 16, 16)] = a1_ref[pl.ds(b * 81 + q * 9, 9), :]

    # ---- conv2: (B*9, 144) @ (144, 32), ReLU -----------------------------------------
    a2 = jnp.dot(p2_ref[...], w2_ref[...], preferred_element_type=f32) + b2_ref[...]
    a2 = jnp.maximum(a2, 0.0)
    a2_ref[...] = a2.astype(bf16)

    # ---- assemble the single conv3 patch per sample: p3[b, r*32 + c] = a2[b*9 + r, c] -
    for b in range(B):
        for r in range(9):
            p3_ref[pl.ds(b, 1), pl.ds(r * 32, 32)] = a2_ref[pl.ds(b * 9 + r, 1), :]

    # ---- conv3 (1x1 spatial output): (B, 288) @ (288, 64), ReLU ----------------------
    feat0 = jnp.dot(p3_ref[...], w3_ref[...], preferred_element_type=f32) + b3_ref[...]
    feat0 = jnp.maximum(feat0, 0.0)

    # ---- fc backbone: 64 -> 256 -> 128 -----------------------------------------------
    h1 = jnp.dot(feat0.astype(bf16), wf1_ref[...], preferred_element_type=f32) + bf1_ref[...]
    h1 = jnp.maximum(h1, 0.0)
    feat = jnp.dot(h1.astype(bf16), wf2_ref[...], preferred_element_type=f32) + bf2_ref[...]
    feat = jnp.maximum(feat, 0.0)

    # ---- heads: one (128, 68) matmul = [mode_fc1 feat-part | dir_mean | dir_logstd] --
    big = jnp.dot(feat.astype(bf16), whead_ref[...], preferred_element_type=f32) + bhead_ref[...]
    hpre = big[:, 0:64]                                 # feat-part of mode_fc hidden (+ bias)
    mean = big[:, 64:66]
    log_std = jnp.clip(big[:, 66:68], LOG_STD_MIN, LOG_STD_MAX)

    # Direction contribution of mode_fc1 (K=2): VPU broadcast-FMA, no MXU pass.
    h = hpre + mean[:, 0:1] * w1d_ref[0:1, :] + mean[:, 1:2] * w1d_ref[1:2, :]
    h = jnp.maximum(h, 0.0)
    logits = jnp.dot(h.astype(bf16), w2m_ref[...], preferred_element_type=f32) + b2m_ref[...]

    # ---- single lane-dense packed output: [mean(2) | log_std(2) | logits(2) | zeros] -
    out_ref[...] = jnp.zeros_like(out_ref)
    out_ref[:, 0:2] = mean.astype(out_ref.dtype)
    out_ref[:, 2:4] = log_std.astype(out_ref.dtype)
    out_ref[:, 4:6] = logits.astype(out_ref.dtype)


def _fused_policy_call(p1, params, B):
    args = (
        p1,
        params["w1"], params["b1"], params["w2"], params["b2"],
        params["w3"], params["b3"],
        params["wf1"], params["bf1"], params["wf2"], params["bf2"],
        params["whead"], params["bhead"], params["w1d"],
        params["w2m"], params["b2m"],
    )
    m1, m2 = B * 81, B * 9
    flops = 2 * (m1 * 32 * 16 + m2 * 144 * 32 + B * 288 * 64
                 + B * 64 * 256 + B * 256 * 128 + B * 128 * 68 + B * 64 * 2)
    bytes_accessed = sum(int(a.size) * a.dtype.itemsize for a in args) + B * 128 * 4

    vmem = pltpu.MemorySpace.VMEM
    return pl.pallas_call(
        functools.partial(_fused_forward_kernel, B=B),
        out_shape=jax.ShapeDtypeStruct((B, 128), jnp.float32),
        in_specs=[pl.BlockSpec(memory_space=vmem) for _ in args],
        out_specs=pl.BlockSpec(memory_space=vmem),
        scratch_shapes=[
            pltpu.VMEM((B * 81, 16), jnp.bfloat16),    # conv1 activations
            pltpu.VMEM((B * 9, 144), jnp.bfloat16),    # conv2 patches
            pltpu.VMEM((B * 9, 32), jnp.bfloat16),     # conv2 activations
            pltpu.VMEM((B, 288), jnp.bfloat16),        # conv3 patch
        ],
        cost_estimate=pl.CostEstimate(flops=flops, transcendentals=0,
                                      bytes_accessed=bytes_accessed),
    )(*args)


# ----------------------------------------------------------------------------
# Forward pass
# ----------------------------------------------------------------------------
@jax.jit
def hybrid_policy_forward(state, params):
    """state: (B, 1, H, W) f32 -> (mean (B,2), log_std (B,2), mode_logits (B,2))."""
    B, C, H, W = state.shape
    h1 = (H - 5) // 2 + 1
    w1 = (W - 5) // 2 + 1
    h2 = (h1 - 3) // 2 + 1
    w2 = (w1 - 3) // 2 + 1
    h3 = (h2 - 3) // 2 + 1
    w3 = (w2 - 3) // 2 + 1
    # Specialized to a 1x1 conv3 output (e.g. 22x22 inputs); there the PyTorch NCHW
    # .view() flatten is just the 64-channel vector, so layouts agree exactly.
    assert C == 1 and h3 == 1 and w3 == 1, "fused kernel requires a 1x1 conv3 output"

    p1 = build_conv1_patches(state)
    packed = _fused_policy_call(p1, params, B)          # (B, 128) lane-dense
    mean = packed[:, 0:2]
    log_std = packed[:, 2:4]
    mode_logits = packed[:, 4:6]
    return mean, log_std, mode_logits


# ----------------------------------------------------------------------------
# Parameter init (deterministic, synthetic; kernel-friendly layouts, bf16 weights)
# ----------------------------------------------------------------------------
def init_params(key=jax.random.PRNGKey(42)):
    ks = list(jax.random.split(key, 19))

    def uni(k, shape, fan_in):
        s = fan_in ** -0.5
        return jax.random.uniform(k, shape, jnp.float32, -s, s)

    p = {}
    # conv weights stored pre-flattened as (K, Cout); conv1 K padded 25 -> 32.
    w1 = uni(ks[0], (25, 16), 25)
    p["w1"] = jnp.pad(w1, ((0, 7), (0, 0))).astype(jnp.bfloat16)
    p["b1"] = uni(ks[1], (1, 16), 25)
    p["w2"] = uni(ks[2], (144, 32), 144).astype(jnp.bfloat16)     # rows: (kh, kw, cin)
    p["b2"] = uni(ks[3], (1, 32), 144)
    p["w3"] = uni(ks[4], (288, 64), 288).astype(jnp.bfloat16)     # rows: (kh, kw, cin)
    p["b3"] = uni(ks[5], (1, 64), 288)
    p["wf1"] = uni(ks[6], (64, 256), 64).astype(jnp.bfloat16)
    p["bf1"] = uni(ks[7], (1, 256), 64)
    p["wf2"] = uni(ks[8], (256, 128), 256).astype(jnp.bfloat16)
    p["bf2"] = uni(ks[9], (1, 128), 256)
    # packed heads: [mode_fc1 feat-part (64) | dir_mean (2) | dir_logstd (2)]
    w_mode1_feat = uni(ks[10], (128, 64), 130)                    # mode_fc = Linear(130, 64)
    w_mean = uni(ks[11], (128, 2), 128)
    w_logstd = uni(ks[12], (128, 2), 128)
    p["whead"] = jnp.concatenate([w_mode1_feat, w_mean, w_logstd], axis=1).astype(jnp.bfloat16)
    b_mode1 = uni(ks[13], (1, 64), 130)
    b_mean = uni(ks[14], (1, 2), 128)
    b_logstd = uni(ks[15], (1, 2), 128)
    p["bhead"] = jnp.concatenate([b_mode1, b_mean, b_logstd], axis=1)   # (1, 68) f32
    p["w1d"] = uni(ks[16], (2, 64), 130)                          # direction part of mode_fc1
    p["w2m"] = uni(ks[17], (64, 2), 64).astype(jnp.bfloat16)
    p["b2m"] = uni(ks[18], (1, 2), 64)
    return p


# ----------------------------------------------------------------------------
# Pure-JAX reference (f32) using the identical patch formulation, for a sanity check
# ----------------------------------------------------------------------------
def reference_forward(state, params):
    f32 = jnp.float32
    B = state.shape[0]
    p1 = build_conv1_patches(state).astype(f32)

    def lin(x, w, b, relu=True):
        y = x @ w.astype(f32) + b
        return jnp.maximum(y, 0.0) if relu else y

    a1 = lin(p1, params["w1"], params["b1"])                       # (B*81, 16)
    p2 = a1.reshape(B, 9, 9, 16).transpose(0, 2, 1, 3).reshape(B * 9, 144)
    a2 = lin(p2, params["w2"], params["b2"])                       # (B*9, 32)
    p3 = a2.reshape(B, 288)
    feat0 = lin(p3, params["w3"], params["b3"])
    h1 = lin(feat0, params["wf1"], params["bf1"])
    feat = lin(h1, params["wf2"], params["bf2"])
    big = feat @ params["whead"].astype(f32) + params["bhead"]
    mean = big[:, 64:66]
    log_std = jnp.clip(big[:, 66:68], LOG_STD_MIN, LOG_STD_MAX)
    h = jnp.maximum(big[:, 0:64] + mean @ params["w1d"], 0.0)
    logits = h @ params["w2m"].astype(f32) + params["b2m"]
    return mean, log_std, logits


if __name__ == "__main__":
    INPUT_SHAPE = (22, 22)   # conv pyramid 22 -> 9 -> 4 -> 1, conv_out = 64
    B = 2

    params = init_params()
    state = jax.random.normal(jax.random.PRNGKey(0), (B, 1, *INPUT_SHAPE), jnp.float32)

    mean, log_std, mode_logits = hybrid_policy_forward(state, params)
    jax.block_until_ready((mean, log_std, mode_logits))

    assert mean.shape == (B, 2) and log_std.shape == (B, 2) and mode_logits.shape == (B, 2)
    assert bool(jnp.all(log_std >= LOG_STD_MIN)) and bool(jnp.all(log_std <= LOG_STD_MAX))

    # sanity check against a pure-JAX f32 reference (bf16 MXU operands -> loose tolerance)
    r_mean, r_log_std, r_logits = reference_forward(state, params)
    assert bool(jnp.allclose(mean, r_mean, atol=5e-2, rtol=5e-2))
    assert bool(jnp.allclose(log_std, r_log_std, atol=5e-2, rtol=5e-2))
    assert bool(jnp.allclose(mode_logits, r_logits, atol=5e-2, rtol=5e-2))

    print("KERNEL_OK")
</pallas_src>

<mosaic_0001>
module attributes {stable_mosaic.version = 11 : i64} {
  func.func @_fused_forward_kernel(%arg0: memref<162x32xbf16, #tpu.memory_space<vmem>>, %arg1: memref<32x16xbf16, #tpu.memory_space<vmem>>, %arg2: memref<1x16xf32, #tpu.memory_space<vmem>>, %arg3: memref<144x32xbf16, #tpu.memory_space<vmem>>, %arg4: memref<1x32xf32, #tpu.memory_space<vmem>>, %arg5: memref<288x64xbf16, #tpu.memory_space<vmem>>, %arg6: memref<1x64xf32, #tpu.memory_space<vmem>>, %arg7: memref<64x256xbf16, #tpu.memory_space<vmem>>, %arg8: memref<1x256xf32, #tpu.memory_space<vmem>>, %arg9: memref<256x128xbf16, #tpu.memory_space<vmem>>, %arg10: memref<1x128xf32, #tpu.memory_space<vmem>>, %arg11: memref<128x68xbf16, #tpu.memory_space<vmem>>, %arg12: memref<1x68xf32, #tpu.memory_space<vmem>>, %arg13: memref<2x64xf32, #tpu.memory_space<vmem>>, %arg14: memref<64x2xbf16, #tpu.memory_space<vmem>>, %arg15: memref<1x2xf32, #tpu.memory_space<vmem>>, %arg16: memref<2x128xf32, #tpu.memory_space<vmem>>, %arg17: memref<162x16xbf16, #tpu.memory_space<vmem>>, %arg18: memref<18x144xbf16, #tpu.memory_space<vmem>>, %arg19: memref<18x32xbf16, #tpu.memory_space<vmem>>, %arg20: memref<2x288xbf16, #tpu.memory_space<vmem>>) attributes {dimension_semantics = [], scalar_prefetch = 0 : i64, scratch_operands = 4 : i64, tpu.core_type = #tpu.core_type<tc>} {
    %c0 = arith.constant 0 : index
    %c0_0 = arith.constant 0 : index
    %0 = vector.load %arg0[%c0, %c0_0] : memref<162x32xbf16, #tpu.memory_space<vmem>>, vector<162x32xbf16>
    %c0_1 = arith.constant 0 : index
    %c0_2 = arith.constant 0 : index
    %1 = vector.load %arg1[%c0_1, %c0_2] : memref<32x16xbf16, #tpu.memory_space<vmem>>, vector<32x16xbf16>
    %cst = arith.constant dense<0.000000e+00> : vector<162x16xf32>
    %2 = tpu.matmul %0, %1, %cst {dimension_numbers = #tpu.dot_dimension_numbers<[1], [0], [0], [1], [0, 0, 1, 1], [], []>} : vector<162x32xbf16>, vector<32x16xbf16>, vector<162x16xf32> -> vector<162x16xf32>
    %c0_3 = arith.constant 0 : index
    %c0_4 = arith.constant 0 : index
    %3 = vector.load %arg2[%c0_3, %c0_4] : memref<1x16xf32, #tpu.memory_space<vmem>>, vector<1x16xf32>
    %4 = vector.broadcast %3 : vector<1x16xf32> to vector<162x16xf32>
    %5 = arith.addf %2, %4 : vector<162x16xf32>
    %cst_5 = arith.constant 0.000000e+00 : f32
    %6 = vector.broadcast %cst_5 : f32 to vector<162x16xf32>
    %7 = arith.maximumf %5, %6 : vector<162x16xf32>
    %8 = arith.truncf %7 : vector<162x16xf32> to vector<162x16xbf16>
    %c0_6 = arith.constant 0 : index
    %c0_7 = arith.constant 0 : index
    %9 = vector.load %arg17[%c0_6, %c0_7] : memref<162x16xbf16, #tpu.memory_space<vmem>>, vector<162x16xbf16>
    tpu.vector_store %arg17[%c0_6, %c0_7], %8 {strides = array<i32>} : memref<162x16xbf16, #tpu.memory_space<vmem>>, vector<162x16xbf16>,
    %c0_8 = arith.constant 0 : index
    %c0_9 = arith.constant 0 : index
    %10 = vector.load %arg17[%c0_8, %c0_9] : memref<162x16xbf16, #tpu.memory_space<vmem>>, vector<9x16xbf16>
    %c0_10 = arith.constant 0 : index
    %c0_11 = arith.constant 0 : index
    %11 = vector.load %arg18[%c0_10, %c0_11] : memref<18x144xbf16, #tpu.memory_space<vmem>>, vector<9x16xbf16>
    tpu.vector_store %arg18[%c0_10, %c0_11], %10 {strides = array<i32>} : memref<18x144xbf16, #tpu.memory_space<vmem>>, vector<9x16xbf16>,
    %c9 = arith.constant 9 : index
    %c0_12 = arith.constant 0 : index
    %12 = vector.load %arg17[%c9, %c0_12] : memref<162x16xbf16, #tpu.memory_space<vmem>>, vector<9x16xbf16>
    %c0_13 = arith.constant 0 : index
    %c16 = arith.constant 16 : index
    %13 = vector.load %arg18[%c0_13, %c16] : memref<18x144xbf16, #tpu.memory_space<vmem>>, vector<9x16xbf16>
    tpu.vector_store %arg18[%c0_13, %c16], %12 {strides = array<i32>} : memref<18x144xbf16, #tpu.memory_space<vmem>>, vector<9x16xbf16>,
    %c18 = arith.constant 18 : index
    %c0_14 = arith.constant 0 : index
    %14 = vector.load %arg17[%c18, %c0_14] : memref<162x16xbf16, #tpu.memory_space<vmem>>, vector<9x16xbf16>
    %c0_15 = arith.constant 0 : index
    %c32 = arith.constant 32 : index
    %15 = vector.load %arg18[%c0_15, %c32] : memref<18x144xbf16, #tpu.memory_space<vmem>>, vector<9x16xbf16>
    tpu.vector_store %arg18[%c0_15, %c32], %14 {strides = array<i32>} : memref<18x144xbf16, #tpu.memory_space<vmem>>, vector<9x16xbf16>,
    %c27 = arith.constant 27 : index
    %c0_16 = arith.constant 0 : index
    %16 = vector.load %arg17[%c27, %c0_16] : memref<162x16xbf16, #tpu.memory_space<vmem>>, vector<9x16xbf16>
    %c0_17 = arith.constant 0 : index
    %c48 = arith.constant 48 : index
    %17 = vector.load %arg18[%c0_17, %c48] : memref<18x144xbf16, #tpu.memory_space<vmem>>, vector<9x16xbf16>
    tpu.vector_store %arg18[%c0_17, %c48], %16 {strides = array<i32>} : memref<18x144xbf16, #tpu.memory_space<vmem>>, vector<9x16xbf16>,
    %c36 = arith.constant 36 : index
    %c0_18 = arith.constant 0 : index
    %18 = vector.load %arg17[%c36, %c0_18] : memref<162x16xbf16, #tpu.memory_space<vmem>>, vector<9x16xbf16>
    %c0_19 = arith.constant 0 : index
    %c64 = arith.constant 64 : index
    %19 = vector.load %arg18[%c0_19, %c64] : memref<18x144xbf16, #tpu.memory_space<vmem>>, vector<9x16xbf16>
    tpu.vector_store %arg18[%c0_19, %c64], %18 {strides = array<i32>} : memref<18x144xbf16, #tpu.memory_space<vmem>>, vector<9x16xbf16>,
    %c45 = arith.constant 45 : index
    %c0_20 = arith.constant 0 : index
    %20 = vector.load %arg17[%c45, %c0_20] : memref<162x16xbf16, #tpu.memory_space<vmem>>, vector<9x16xbf16>
    %c0_21 = arith.constant 0 : index
    %c80 = arith.constant 80 : index
    %21 = vector.load %arg18[%c0_21, %c80] : memref<18x144xbf16, #tpu.memory_space<vmem>>, vector<9x16xbf16>
    tpu.vector_store %arg18[%c0_21, %c80], %20 {strides = array<i32>} : memref<18x144xbf16, #tpu.memory_space<vmem>>, vector<9x16xbf16>,
    %c54 = arith.constant 54 : index
    %c0_22 = arith.constant 0 : index
    %22 = vector.load %arg17[%c54, %c0_22] : memref<162x16xbf16, #tpu.memory_space<vmem>>, vector<9x16xbf16>
    %c0_23 = arith.constant 0 : index
    %c96 = arith.constant 96 : index
    %23 = vector.load %arg18[%c0_23, %c96] : memref<18x144xbf16, #tpu.memory_space<vmem>>, vector<9x16xbf16>
    tpu.vector_store %arg18[%c0_23, %c96], %22 {strides = array<i32>} : memref<18x144xbf16, #tpu.memory_space<vmem>>, vector<9x16xbf16>,
    %c63 = arith.constant 63 : index
    %c0_24 = arith.constant 0 : index
    %24 = vector.load %arg17[%c63, %c0_24] : memref<162x16xbf16, #tpu.memory_space<vmem>>, vector<9x16xbf16>
    %c0_25 = arith.constant 0 : index
    %c112 = arith.constant 112 : index
    %25 = vector.load %arg18[%c0_25, %c112] : memref<18x144xbf16, #tpu.memory_space<vmem>>, vector<9x16xbf16>
    tpu.vector_store %arg18[%c0_25, %c112], %24 {strides = array<i32>} : memref<18x144xbf16, #tpu.memory_space<vmem>>, vector<9x16xbf16>,
    %c72 = arith.constant 72 : index
    %c0_26 = arith.constant 0 : index
    %26 = vector.load %arg17[%c72, %c0_26] : memref<162x16xbf16, #tpu.memory_space<vmem>>, vector<9x16xbf16>
    %c0_27 = arith.constant 0 : index
    %c128 = arith.constant 128 : index
    %27 = vector.load %arg18[%c0_27, %c128] : memref<18x144xbf16, #tpu.memory_space<vmem>>, vector<9x16xbf16>
    tpu.vector_store %arg18[%c0_27, %c128], %26 {strides = array<i32>} : memref<18x144xbf16, #tpu.memory_space<vmem>>, vector<9x16xbf16>,
    %c81 = arith.constant 81 : index
    %c0_28 = arith.constant 0 : index
    %28 = vector.load %arg17[%c81, %c0_28] : memref<162x16xbf16, #tpu.memory_space<vmem>>, vector<9x16xbf16>
    %c9_29 = arith.constant 9 : index
    %c0_30 = arith.constant 0 : index
    %29 = vector.load %arg18[%c9_29, %c0_30] : memref<18x144xbf16, #tpu.memory_space<vmem>>, vector<9x16xbf16>
    tpu.vector_store %arg18[%c9_29, %c0_30], %28 {strides = array<i32>} : memref<18x144xbf16, #tpu.memory_space<vmem>>, vector<9x16xbf16>,
    %c90 = arith.constant 90 : index
    %c0_31 = arith.constant 0 : index
    %30 = vector.load %arg17[%c90, %c0_31] : memref<162x16xbf16, #tpu.memory_space<vmem>>, vector<9x16xbf16>
    %c9_32 = arith.constant 9 : index
    %c16_33 = arith.constant 16 : index
    %31 = vector.load %arg18[%c9_32, %c16_33] : memref<18x144xbf16, #tpu.memory_space<vmem>>, vector<9x16xbf16>
    tpu.vector_store %arg18[%c9_32, %c16_33], %30 {strides = array<i32>} : memref<18x144xbf16, #tpu.memory_space<vmem>>, vector<9x16xbf16>,
    %c99 = arith.constant 99 : index
    %c0_34 = arith.constant 0 : index
    %32 = vector.load %arg17[%c99, %c0_34] : memref<162x16xbf16, #tpu.memory_space<vmem>>, vector<9x16xbf16>
    %c9_35 = arith.constant 9 : index
    %c32_36 = arith.constant 32 : index
    %33 = vector.load %arg18[%c9_35, %c32_36] : memref<18x144xbf16, #tpu.memory_space<vmem>>, vector<9x16xbf16>
    tpu.vector_store %arg18[%c9_35, %c32_36], %32 {strides = array<i32>} : memref<18x144xbf16, #tpu.memory_space<vmem>>, vector<9x16xbf16>,
    %c108 = arith.constant 108 : index
    %c0_37 = arith.constant 0 : index
    %34 = vector.load %arg17[%c108, %c0_37] : memref<162x16xbf16, #tpu.memory_space<vmem>>, vector<9x16xbf16>
    %c9_38 = arith.constant 9 : index
    %c48_39 = arith.constant 48 : index
    %35 = vector.load %arg18[%c9_38, %c48_39] : memref<18x144xbf16, #tpu.memory_space<vmem>>, vector<9x16xbf16>
    tpu.vector_store %arg18[%c9_38, %c48_39], %34 {strides = array<i32>} : memref<18x144xbf16, #tpu.memory_space<vmem>>, vector<9x16xbf16>,
    %c117 = arith.constant 117 : index
    %c0_40 = arith.constant 0 : index
    %36 = vector.load %arg17[%c117, %c0_40] : memref<162x16xbf16, #tpu.memory_space<vmem>>, vector<9x16xbf16>
    %c9_41 = arith.constant 9 : index
    %c64_42 = arith.constant 64 : index
    %37 = vector.load %arg18[%c9_41, %c64_42] : memref<18x144xbf16, #tpu.memory_space<vmem>>, vector<9x16xbf16>
    tpu.vector_store %arg18[%c9_41, %c64_42], %36 {strides = array<i32>} : memref<18x144xbf16, #tpu.memory_space<vmem>>, vector<9x16xbf16>,
    %c126 = arith.constant 126 : index
    %c0_43 = arith.constant 0 : index
    %38 = vector.load %arg17[%c126, %c0_43] : memref<162x16xbf16, #tpu.memory_space<vmem>>, vector<9x16xbf16>
    %c9_44 = arith.constant 9 : index
    %c80_45 = arith.constant 80 : index
    %39 = vector.load %arg18[%c9_44, %c80_45] : memref<18x144xbf16, #tpu.memory_space<vmem>>, vector<9x16xbf16>
    tpu.vector_store %arg18[%c9_44, %c80_45], %38 {strides = array<i32>} : memref<18x144xbf16, #tpu.memory_space<vmem>>, vector<9x16xbf16>,
    %c135 = arith.constant 135 : index
    %c0_46 = arith.constant 0 : index
    %40 = vector.load %arg17[%c135, %c0_46] : memref<162x16xbf16, #tpu.memory_space<vmem>>, vector<9x16xbf16>
    %c9_47 = arith.constant 9 : index
    %c96_48 = arith.constant 96 : index
    %41 = vector.load %arg18[%c9_47, %c96_48] : memref<18x144xbf16, #tpu.memory_space<vmem>>, vector<9x16xbf16>
    tpu.vector_store %arg18[%c9_47, %c96_48], %40 {strides = array<i32>} : memref<18x144xbf16, #tpu.memory_space<vmem>>, vector<9x16xbf16>,
    %c144 = arith.constant 144 : index
    %c0_49 = arith.constant 0 : index
    %42 = vector.load %arg17[%c144, %c0_49] : memref<162x16xbf16, #tpu.memory_space<vmem>>, vector<9x16xbf16>
    %c9_50 = arith.constant 9 : index
    %c112_51 = arith.constant 112 : index
    %43 = vector.load %arg18[%c9_50, %c112_51] : memref<18x144xbf16, #tpu.memory_space<vmem>>, vector<9x16xbf16>
    tpu.vector_store %arg18[%c9_50, %c112_51], %42 {strides = array<i32>} : memref<18x144xbf16, #tpu.memory_space<vmem>>, vector<9x16xbf16>,
    %c153 = arith.constant 153 : index
    %c0_52 = arith.constant 0 : index
    %44 = vector.load %arg17[%c153, %c0_52] : memref<162x16xbf16, #tpu.memory_space<vmem>>, vector<9x16xbf16>
    %c9_53 = arith.constant 9 : index
    %c128_54 = arith.constant 128 : index
    %45 = vector.load %arg18[%c9_53, %c128_54] : memref<18x144xbf16, #tpu.memory_space<vmem>>, vector<9x16xbf16>
    tpu.vector_store %arg18[%c9_53, %c128_54], %44 {strides = array<i32>} : memref<18x144xbf16, #tpu.memory_space<vmem>>, vector<9x16xbf16>,
    %c0_55 = arith.constant 0 : index
    %c0_56 = arith.constant 0 : index
    %46 = vector.load %arg18[%c0_55, %c0_56] : memref<18x144xbf16, #tpu.memory_space<vmem>>, vector<18x144xbf16>
    %c0_57 = arith.constant 0 : index
    %c0_58 = arith.constant 0 : index
    %47 = vector.load %arg3[%c0_57, %c0_58] : memref<144x32xbf16, #tpu.memory_space<vmem>>, vector<144x32xbf16>
    %cst_59 = arith.constant dense<0.000000e+00> : vector<18x32xf32>
    %48 = tpu.matmul %46, %47, %cst_59 {dimension_numbers = #tpu.dot_dimension_numbers<[1], [0], [0], [1], [0, 0, 1, 1], [], []>} : vector<18x144xbf16>, vector<144x32xbf16>, vector<18x32xf32> -> vector<18x32xf32>
    %c0_60 = arith.constant 0 : index
    %c0_61 = arith.constant 0 : index
    %49 = vector.load %arg4[%c0_60, %c0_61] : memref<1x32xf32, #tpu.memory_space<vmem>>, vector<1x32xf32>
    %50 = vector.broadcast %49 : vector<1x32xf32> to vector<18x32xf32>
    %51 = arith.addf %48, %50 : vector<18x32xf32>
    %cst_62 = arith.constant 0.000000e+00 : f32
    %52 = vector.broadcast %cst_62 : f32 to vector<18x32xf32>
    %53 = arith.maximumf %51, %52 : vector<18x32xf32>
    %54 = arith.truncf %53 : vector<18x32xf32> to vector<18x32xbf16>
    %c0_63 = arith.constant 0 : index
    %c0_64 = arith.constant 0 : index
    %55 = vector.load %arg19[%c0_63, %c0_64] : memref<18x32xbf16, #tpu.memory_space<vmem>>, vector<18x32xbf16>
    tpu.vector_store %arg19[%c0_63, %c0_64], %54 {strides = array<i32>} : memref<18x32xbf16, #tpu.memory_space<vmem>>, vector<18x32xbf16>,
    %c0_65 = arith.constant 0 : index
    %c0_66 = arith.constant 0 : index
    %56 = vector.load %arg19[%c0_65, %c0_66] : memref<18x32xbf16, #tpu.memory_space<vmem>>, vector<1x32xbf16>
    %c0_67 = arith.constant 0 : index
    %c0_68 = arith.constant 0 : index
    %57 = vector.load %arg20[%c0_67, %c0_68] : memref<2x288xbf16, #tpu.memory_space<vmem>>, vector<1x32xbf16>
    tpu.vector_store %arg20[%c0_67, %c0_68], %56 {strides = array<i32>} : memref<2x288xbf16, #tpu.memory_space<vmem>>, vector<1x32xbf16>,
    %c1 = arith.constant 1 : index
    %c0_69 = arith.constant 0 : index
    %58 = vector.load %arg19[%c1, %c0_69] : memref<18x32xbf16, #tpu.memory_space<vmem>>, vector<1x32xbf16>
    %c0_70 = arith.constant 0 : index
    %c32_71 = arith.constant 32 : index
    %59 = vector.load %arg20[%c0_70, %c32_71] : memref<2x288xbf16, #tpu.memory_space<vmem>>, vector<1x32xbf16>
    tpu.vector_store %arg20[%c0_70, %c32_71], %58 {strides = array<i32>} : memref<2x288xbf16, #tpu.memory_space<vmem>>, vector<1x32xbf16>,
    %c2 = arith.constant 2 : index
    %c0_72 = arith.constant 0 : index
    %60 = vector.load %arg19[%c2, %c0_72] : memref<18x32xbf16, #tpu.memory_space<vmem>>, vector<1x32xbf16>
    %c0_73 = arith.constant 0 : index
    %c64_74 = arith.constant 64 : index
    %61 = vector.load %arg20[%c0_73, %c64_74] : memref<2x288xbf16, #tpu.memory_space<vmem>>, vector<1x32xbf16>
    tpu.vector_store %arg20[%c0_73, %c64_74], %60 {strides = array<i32>} : memref<2x288xbf16, #tpu.memory_space<vmem>>, vector<1x32xbf16>,
    %c3 = arith.constant 3 : index
    %c0_75 = arith.constant 0 : index
    %62 = vector.load %arg19[%c3, %c0_75] : memref<18x32xbf16, #tpu.memory_space<vmem>>, vector<1x32xbf16>
    %c0_76 = arith.constant 0 : index
    %c96_77 = arith.constant 96 : index
    %63 = vector.load %arg20[%c0_76, %c96_77] : memref<2x288xbf16, #tpu.memory_space<vmem>>, vector<1x32xbf16>
    tpu.vector_store %arg20[%c0_76, %c96_77], %62 {strides = array<i32>} : memref<2x288xbf16, #tpu.memory_space<vmem>>, vector<1x32xbf16>,
    %c4 = arith.constant 4 : index
    %c0_78 = arith.constant 0 : index
    %64 = vector.load %arg19[%c4, %c0_78] : memref<18x32xbf16, #tpu.memory_space<vmem>>, vector<1x32xbf16>
    %c0_79 = arith.constant 0 : index
    %c128_80 = arith.constant 128 : index
    %65 = vector.load %arg20[%c0_79, %c128_80] : memref<2x288xbf16, #tpu.memory_space<vmem>>, vector<1x32xbf16>
    tpu.vector_store %arg20[%c0_79, %c128_80], %64 {strides = array<i32>} : memref<2x288xbf16, #tpu.memory_space<vmem>>, vector<1x32xbf16>,
    %c5 = arith.constant 5 : index
    %c0_81 = arith.constant 0 : index
    %66 = vector.load %arg19[%c5, %c0_81] : memref<18x32xbf16, #tpu.memory_space<vmem>>, vector<1x32xbf16>
    %c0_82 = arith.constant 0 : index
    %c160 = arith.constant 160 : index
    %67 = vector.load %arg20[%c0_82, %c160] : memref<2x288xbf16, #tpu.memory_space<vmem>>, vector<1x32xbf16>
    tpu.vector_store %arg20[%c0_82, %c160], %66 {strides = array<i32>} : memref<2x288xbf16, #tpu.memory_space<vmem>>, vector<1x32xbf16>,
    %c6 = arith.constant 6 : index
    %c0_83 = arith.constant 0 : index
    %68 = vector.load %arg19[%c6, %c0_83] : memref<18x32xbf16, #tpu.memory_space<vmem>>, vector<1x32xbf16>
    %c0_84 = arith.constant 0 : index
    %c192 = arith.constant 192 : index
    %69 = vector.load %arg20[%c0_84, %c192] : memref<2x288xbf16, #tpu.memory_space<vmem>>, vector<1x32xbf16>
    tpu.vector_store %arg20[%c0_84, %c192], %68 {strides = array<i32>} : memref<2x288xbf16, #tpu.memory_space<vmem>>, vector<1x32xbf16>,
    %c7 = arith.constant 7 : index
    %c0_85 = arith.constant 0 : index
    %70 = vector.load %arg19[%c7, %c0_85] : memref<18x32xbf16, #tpu.memory_space<vmem>>, vector<1x32xbf16>
    %c0_86 = arith.constant 0 : index
    %c224 = arith.constant 224 : index
    %71 = vector.load %arg20[%c0_86, %c224] : memref<2x288xbf16, #tpu.memory_space<vmem>>, vector<1x32xbf16>
    tpu.vector_store %arg20[%c0_86, %c224], %70 {strides = array<i32>} : memref<2x288xbf16, #tpu.memory_space<vmem>>, vector<1x32xbf16>,
    %c8 = arith.constant 8 : index
    %c0_87 = arith.constant 0 : index
    %72 = vector.load %arg19[%c8, %c0_87] : memref<18x32xbf16, #tpu.memory_space<vmem>>, vector<1x32xbf16>
    %c0_88 = arith.constant 0 : index
    %c256 = arith.constant 256 : index
    %73 = vector.load %arg20[%c0_88, %c256] : memref<2x288xbf16, #tpu.memory_space<vmem>>, vector<1x32xbf16>
    tpu.vector_store %arg20[%c0_88, %c256], %72 {strides = array<i32>} : memref<2x288xbf16, #tpu.memory_space<vmem>>, vector<1x32xbf16>,
    %c9_89 = arith.constant 9 : index
    %c0_90 = arith.constant 0 : index
    %74 = vector.load %arg19[%c9_89, %c0_90] : memref<18x32xbf16, #tpu.memory_space<vmem>>, vector<1x32xbf16>
    %c1_91 = arith.constant 1 : index
    %c0_92 = arith.constant 0 : index
    %75 = vector.load %arg20[%c1_91, %c0_92] : memref<2x288xbf16, #tpu.memory_space<vmem>>, vector<1x32xbf16>
    tpu.vector_store %arg20[%c1_91, %c0_92], %74 {strides = array<i32>} : memref<2x288xbf16, #tpu.memory_space<vmem>>, vector<1x32xbf16>,
    %c10 = arith.constant 10 : index
    %c0_93 = arith.constant 0 : index
    %76 = vector.load %arg19[%c10, %c0_93] : memref<18x32xbf16, #tpu.memory_space<vmem>>, vector<1x32xbf16>
    %c1_94 = arith.constant 1 : index
    %c32_95 = arith.constant 32 : index
    %77 = vector.load %arg20[%c1_94, %c32_95] : memref<2x288xbf16, #tpu.memory_space<vmem>>, vector<1x32xbf16>
    tpu.vector_store %arg20[%c1_94, %c32_95], %76 {strides = array<i32>} : memref<2x288xbf16, #tpu.memory_space<vmem>>, vector<1x32xbf16>,
    %c11 = arith.constant 11 : index
    %c0_96 = arith.constant 0 : index
    %78 = vector.load %arg19[%c11, %c0_96] : memref<18x32xbf16, #tpu.memory_space<vmem>>, vector<1x32xbf16>
    %c1_97 = arith.constant 1 : index
    %c64_98 = arith.constant 64 : index
    %79 = vector.load %arg20[%c1_97, %c64_98] : memref<2x288xbf16, #tpu.memory_space<vmem>>, vector<1x32xbf16>
    tpu.vector_store %arg20[%c1_97, %c64_98], %78 {strides = array<i32>} : memref<2x288xbf16, #tpu.memory_space<vmem>>, vector<1x32xbf16>,
    %c12 = arith.constant 12 : index
    %c0_99 = arith.constant 0 : index
    %80 = vector.load %arg19[%c12, %c0_99] : memref<18x32xbf16, #tpu.memory_space<vmem>>, vector<1x32xbf16>
    %c1_100 = arith.constant 1 : index
    %c96_101 = arith.constant 96 : index
    %81 = vector.load %arg20[%c1_100, %c96_101] : memref<2x288xbf16, #tpu.memory_space<vmem>>, vector<1x32xbf16>
    tpu.vector_store %arg20[%c1_100, %c96_101], %80 {strides = array<i32>} : memref<2x288xbf16, #tpu.memory_space<vmem>>, vector<1x32xbf16>,
    %c13 = arith.constant 13 : index
    %c0_102 = arith.constant 0 : index
    %82 = vector.load %arg19[%c13, %c0_102] : memref<18x32xbf16, #tpu.memory_space<vmem>>, vector<1x32xbf16>
    %c1_103 = arith.constant 1 : index
    %c128_104 = arith.constant 128 : index
    %83 = vector.load %arg20[%c1_103, %c128_104] : memref<2x288xbf16, #tpu.memory_space<vmem>>, vector<1x32xbf16>
    tpu.vector_store %arg20[%c1_103, %c128_104], %82 {strides = array<i32>} : memref<2x288xbf16, #tpu.memory_space<vmem>>, vector<1x32xbf16>,
    %c14 = arith.constant 14 : index
    %c0_105 = arith.constant 0 : index
    %84 = vector.load %arg19[%c14, %c0_105] : memref<18x32xbf16, #tpu.memory_space<vmem>>, vector<1x32xbf16>
    %c1_106 = arith.constant 1 : index
    %c160_107 = arith.constant 160 : index
    %85 = vector.load %arg20[%c1_106, %c160_107] : memref<2x288xbf16, #tpu.memory_space<vmem>>, vector<1x32xbf16>
    tpu.vector_store %arg20[%c1_106, %c160_107], %84 {strides = array<i32>} : memref<2x288xbf16, #tpu.memory_space<vmem>>, vector<1x32xbf16>,
    %c15 = arith.constant 15 : index
    %c0_108 = arith.constant 0 : index
    %86 = vector.load %arg19[%c15, %c0_108] : memref<18x32xbf16, #tpu.memory_space<vmem>>, vector<1x32xbf16>
    %c1_109 = arith.constant 1 : index
    %c192_110 = arith.constant 192 : index
    %87 = vector.load %arg20[%c1_109, %c192_110] : memref<2x288xbf16, #tpu.memory_space<vmem>>, vector<1x32xbf16>
    tpu.vector_store %arg20[%c1_109, %c192_110], %86 {strides = array<i32>} : memref<2x288xbf16, #tpu.memory_space<vmem>>, vector<1x32xbf16>,
    %c16_111 = arith.constant 16 : index
    %c0_112 = arith.constant 0 : index
    %88 = vector.load %arg19[%c16_111, %c0_112] : memref<18x32xbf16, #tpu.memory_space<vmem>>, vector<1x32xbf16>
    %c1_113 = arith.constant 1 : index
    %c224_114 = arith.constant 224 : index
    %89 = vector.load %arg20[%c1_113, %c224_114] : memref<2x288xbf16, #tpu.memory_space<vmem>>, vector<1x32xbf16>
    tpu.vector_store %arg20[%c1_113, %c224_114], %88 {strides = array<i32>} : memref<2x288xbf16, #tpu.memory_space<vmem>>, vector<1x32xbf16>,
    %c17 = arith.constant 17 : index
    %c0_115 = arith.constant 0 : index
    %90 = vector.load %arg19[%c17, %c0_115] : memref<18x32xbf16, #tpu.memory_space<vmem>>, vector<1x32xbf16>
    %c1_116 = arith.constant 1 : index
    %c256_117 = arith.constant 256 : index
    %91 = vector.load %arg20[%c1_116, %c256_117] : memref<2x288xbf16, #tpu.memory_space<vmem>>, vector<1x32xbf16>
    tpu.vector_store %arg20[%c1_116, %c256_117], %90 {strides = array<i32>} : memref<2x288xbf16, #tpu.memory_space<vmem>>, vector<1x32xbf16>,
    %c0_118 = arith.constant 0 : index
    %c0_119 = arith.constant 0 : index
    %92 = vector.load %arg20[%c0_118, %c0_119] : memref<2x288xbf16, #tpu.memory_space<vmem>>, vector<2x288xbf16>
    %c0_120 = arith.constant 0 : index
    %c0_121 = arith.constant 0 : index
    %93 = vector.load %arg5[%c0_120, %c0_121] : memref<288x64xbf16, #tpu.memory_space<vmem>>, vector<288x64xbf16>
    %cst_122 = arith.constant dense<0.000000e+00> : vector<2x64xf32>
    %94 = tpu.matmul %92, %93, %cst_122 {dimension_numbers = #tpu.dot_dimension_numbers<[1], [0], [0], [1], [0, 0, 1, 1], [], []>} : vector<2x288xbf16>, vector<288x64xbf16>, vector<2x64xf32> -> vector<2x64xf32>
    %c0_123 = arith.constant 0 : index
    %c0_124 = arith.constant 0 : index
    %95 = vector.load %arg6[%c0_123, %c0_124] : memref<1x64xf32, #tpu.memory_space<vmem>>, vector<1x64xf32>
    %96 = vector.broadcast %95 : vector<1x64xf32> to vector<2x64xf32>
    %97 = arith.addf %94, %96 : vector<2x64xf32>
    %cst_125 = arith.constant 0.000000e+00 : f32
    %98 = vector.broadcast %cst_125 : f32 to vector<2x64xf32>
    %99 = arith.maximumf %97, %98 : vector<2x64xf32>
    %100 = arith.truncf %99 : vector<2x64xf32> to vector<2x64xbf16>
    %c0_126 = arith.constant 0 : index
    %c0_127 = arith.constant 0 : index
    %101 = vector.load %arg7[%c0_126, %c0_127] : memref<64x256xbf16, #tpu.memory_space<vmem>>, vector<64x256xbf16>
    %cst_128 = arith.constant dense<0.000000e+00> : vector<2x256xf32>
    %102 = tpu.matmul %100, %101, %cst_128 {dimension_numbers = #tpu.dot_dimension_numbers<[1], [0], [0], [1], [0, 0, 1, 1], [], []>} : vector<2x64xbf16>, vector<64x256xbf16>, vector<2x256xf32> -> vector<2x256xf32>
    %c0_129 = arith.constant 0 : index
    %c0_130 = arith.constant 0 : index
    %103 = vector.load %arg8[%c0_129, %c0_130] : memref<1x256xf32, #tpu.memory_space<vmem>>, vector<1x256xf32>
    %104 = vector.broadcast %103 : vector<1x256xf32> to vector<2x256xf32>
    %105 = arith.addf %102, %104 : vector<2x256xf32>
    %cst_131 = arith.constant 0.000000e+00 : f32
    %106 = vector.broadcast %cst_131 : f32 to vector<2x256xf32>
    %107 = arith.maximumf %105, %106 : vector<2x256xf32>
    %108 = arith.truncf %107 : vector<2x256xf32> to vector<2x256xbf16>
    %c0_132 = arith.constant 0 : index
    %c0_133 = arith.constant 0 : index
    %109 = vector.load %arg9[%c0_132, %c0_133] : memref<256x128xbf16, #tpu.memory_space<vmem>>, vector<256x128xbf16>
    %cst_134 = arith.constant dense<0.000000e+00> : vector<2x128xf32>
    %110 = tpu.matmul %108, %109, %cst_134 {dimension_numbers = #tpu.dot_dimension_numbers<[1], [0], [0], [1], [0, 0, 1, 1], [], []>} : vector<2x256xbf16>, vector<256x128xbf16>, vector<2x128xf32> -> vector<2x128xf32>
    %c0_135 = arith.constant 0 : index
    %c0_136 = arith.constant 0 : index
    %111 = vector.load %arg10[%c0_135, %c0_136] : memref<1x128xf32, #tpu.memory_space<vmem>>, vector<1x128xf32>
    %112 = vector.broadcast %111 : vector<1x128xf32> to vector<2x128xf32>
    %113 = arith.addf %110, %112 : vector<2x128xf32>
    %cst_137 = arith.constant 0.000000e+00 : f32
    %114 = vector.broadcast %cst_137 : f32 to vector<2x128xf32>
    %115 = arith.maximumf %113, %114 : vector<2x128xf32>
    %116 = arith.truncf %115 : vector<2x128xf32> to vector<2x128xbf16>
    %c0_138 = arith.constant 0 : index
    %c0_139 = arith.constant 0 : index
    %117 = vector.load %arg11[%c0_138, %c0_139] : memref<128x68xbf16, #tpu.memory_space<vmem>>, vector<128x68xbf16>
    %cst_140 = arith.constant dense<0.000000e+00> : vector<2x68xf32>
    %118 = tpu.matmul %116, %117, %cst_140 {dimension_numbers = #tpu.dot_dimension_numbers<[1], [0], [0], [1], [0, 0, 1, 1], [], []>} : vector<2x128xbf16>, vector<128x68xbf16>, vector<2x68xf32> -> vector<2x68xf32>
    %c0_141 = arith.constant 0 : index
    %c0_142 = arith.constant 0 : index
    %119 = vector.load %arg12[%c0_141, %c0_142] : memref<1x68xf32, #tpu.memory_space<vmem>>, vector<1x68xf32>
    %120 = vector.broadcast %119 : vector<1x68xf32> to vector<2x68xf32>
    %121 = arith.addf %118, %120 : vector<2x68xf32>
    %122 = vector.extract_strided_slice %121 {offsets = [0, 0], sizes = [2, 64], strides = [1, 1]} : vector<2x68xf32> to vector<2x64xf32>
    %123 = vector.extract_strided_slice %121 {offsets = [0, 64], sizes = [2, 2], strides = [1, 1]} : vector<2x68xf32> to vector<2x2xf32>
    %124 = vector.extract_strided_slice %121 {offsets = [0, 66], sizes = [2, 2], strides = [1, 1]} : vector<2x68xf32> to vector<2x2xf32>
    %cst_143 = arith.constant -2.000000e+01 : f32
    %cst_144 = arith.constant 2.000000e+00 : f32
    %125 = vector.broadcast %cst_143 : f32 to vector<2x2xf32>
    %126 = arith.maximumf %125, %124 : vector<2x2xf32>
    %127 = vector.broadcast %cst_144 : f32 to vector<2x2xf32>
    %128 = arith.minimumf %127, %126 : vector<2x2xf32>
    %129 = vector.extract_strided_slice %123 {offsets = [0, 0], sizes = [2, 1], strides = [1, 1]} : vector<2x2xf32> to vector<2x1xf32>
    %c0_145 = arith.constant 0 : index
    %c0_146 = arith.constant 0 : index
    %130 = vector.load %arg13[%c0_145, %c0_146] : memref<2x64xf32, #tpu.memory_space<vmem>>, vector<1x64xf32>
    %131 = vector.broadcast %129 : vector<2x1xf32> to vector<2x64xf32>
    %132 = vector.broadcast %130 : vector<1x64xf32> to vector<2x64xf32>
    %133 = arith.mulf %131, %132 : vector<2x64xf32>
    %134 = arith.addf %122, %133 : vector<2x64xf32>
    %135 = vector.extract_strided_slice %123 {offsets = [0, 1], sizes = [2, 1], strides = [1, 1]} : vector<2x2xf32> to vector<2x1xf32>
    %c1_147 = arith.constant 1 : index
    %c0_148 = arith.constant 0 : index
    %136 = vector.load %arg13[%c1_147, %c0_148] : memref<2x64xf32, #tpu.memory_space<vmem>>, vector<1x64xf32>
    %137 = vector.broadcast %135 : vector<2x1xf32> to vector<2x64xf32>
    %138 = vector.broadcast %136 : vector<1x64xf32> to vector<2x64xf32>
    %139 = arith.mulf %137, %138 : vector<2x64xf32>
    %140 = arith.addf %134, %139 : vector<2x64xf32>
    %cst_149 = arith.constant 0.000000e+00 : f32
    %141 = vector.broadcast %cst_149 : f32 to vector<2x64xf32>
    %142 = arith.maximumf %140, %141 : vector<2x64xf32>
    %143 = arith.truncf %142 : vector<2x64xf32> to vector<2x64xbf16>
    %c0_150 = arith.constant 0 : index
    %c0_151 = arith.constant 0 : index
    %144 = vector.load %arg14[%c0_150, %c0_151] : memref<64x2xbf16, #tpu.memory_space<vmem>>, vector<64x2xbf16>
    %cst_152 = arith.constant dense<0.000000e+00> : vector<2x2xf32>
    %145 = tpu.matmul %143, %144, %cst_152 {dimension_numbers = #tpu.dot_dimension_numbers<[1], [0], [0], [1], [0, 0, 1, 1], [], []>} : vector<2x64xbf16>, vector<64x2xbf16>, vector<2x2xf32> -> vector<2x2xf32>
    %c0_153 = arith.constant 0 : index
    %c0_154 = arith.constant 0 : index
    %146 = vector.load %arg15[%c0_153, %c0_154] : memref<1x2xf32, #tpu.memory_space<vmem>>, vector<1x2xf32>
    %147 = vector.broadcast %146 : vector<1x2xf32> to vector<2x2xf32>
    %148 = arith.addf %145, %147 : vector<2x2xf32>
    %cst_155 = arith.constant 0.000000e+00 : f32
    %149 = vector.broadcast %cst_155 : f32 to vector<2x128xf32>
    %c0_156 = arith.constant 0 : index
    %c0_157 = arith.constant 0 : index
    %150 = vector.load %arg16[%c0_156, %c0_157] : memref<2x128xf32, #tpu.memory_space<vmem>>, vector<2x128xf32>
    tpu.vector_store %arg16[%c0_156, %c0_157], %149 {strides = array<i32>} : memref<2x128xf32, #tpu.memory_space<vmem>>, vector<2x128xf32>,
    %c0_158 = arith.constant 0 : index
    %c0_159 = arith.constant 0 : index
    %151 = vector.load %arg16[%c0_158, %c0_159] : memref<2x128xf32, #tpu.memory_space<vmem>>, vector<2x2xf32>
    tpu.vector_store %arg16[%c0_158, %c0_159], %123 {strides = array<i32>} : memref<2x128xf32, #tpu.memory_space<vmem>>, vector<2x2xf32>,
    %c0_160 = arith.constant 0 : index
    %c2_161 = arith.constant 2 : index
    %152 = vector.load %arg16[%c0_160, %c2_161] : memref<2x128xf32, #tpu.memory_space<vmem>>, vector<2x2xf32>
    tpu.vector_store %arg16[%c0_160, %c2_161], %128 {strides = array<i32>} : memref<2x128xf32, #tpu.memory_space<vmem>>, vector<2x2xf32>,
    %c0_162 = arith.constant 0 : index
    %c4_163 = arith.constant 4 : index
    %153 = vector.load %arg16[%c0_162, %c4_163] : memref<2x128xf32, #tpu.memory_space<vmem>>, vector<2x2xf32>
    tpu.vector_store %arg16[%c0_162, %c4_163], %148 {strides = array<i32>} : memref<2x128xf32, #tpu.memory_space<vmem>>, vector<2x2xf32>,
    return
  }
}

</mosaic_0001>

<bundles_post_ra>
// kernel: hybrid_policy_forward.1
= control target key start
LH: loop header
LB: loop body
LE: loop exit
PB: predicated region body
PF: predicated region fallthrough
CT: control target
= control target key end

     0   :  { %v2672_v0 = vmov 0.0   ;;  %vm3490_vm0 = vmmov 0   ;;  %vm3489_vm1 = vcmask 261120   ;;  %vm411_vm2 = vcmask 125952   ;;  %v440_v35 = vld [vmem:[#allocation3 + $0x8] sm:$0x1]  ;;  %s3471_s1 = inlined_call_operand.vmem [shape: bf16[32,16], index: 1, kind: input, shape index: {}]   ;;  %s3472_s0 = inlined_call_operand.vmem [shape: bf16[162,32], index: 0, kind: input, shape index: {}]   ;;  %s3473_s2 = inlined_call_operand.vmem [shape: f32[1,16], index: 2, kind: input, shape index: {}]   ;;  %s3474_s3 = inlined_call_operand.vmem [shape: bf16[144,32], index: 3, kind: input, shape index: {}]   ;;  %s3475_s4 = inlined_call_operand.vmem [shape: f32[1,32], index: 4, kind: input, shape index: {}]   ;;  %s3476_s5 = inlined_call_operand.vmem [shape: bf16[288,64], index: 5, kind: input, shape index: {}]   ;;  %s3477_s7 = inlined_call_operand.vmem [shape: bf16[64,256], index: 7, kind: input, shape index: {}]   ;;  %s3478_s9 = inlined_call_operand.vmem [shape: bf16[256,128], index: 9, kind: input, shape index: {}]   ;;  %s3479_s6 = inlined_call_operand.vmem [shape: f32[1,64], index: 6, kind: input, shape index: {}]   ;;  %s3480_s11 = inlined_call_operand.vmem [shape: bf16[128,68], index: 11, kind: input, shape index: {}]   ;;  %s3481_s8 = inlined_call_operand.vmem [shape: f32[1,256], index: 8, kind: input, shape index: {}]   ;;  %s3482_s10 = inlined_call_operand.vmem [shape: f32[1,128], index: 10, kind: input, shape index: {}]   ;;  %s3483_s14 = inlined_call_operand.vmem [shape: bf16[64,2], index: 14, kind: input, shape index: {}]   ;;  %s3484_s12 = inlined_call_operand.vmem [shape: f32[1,68], index: 12, kind: input, shape index: {}]   ;;  %s3485_s16 = inlined_call_operand.vmem [shape: f32[2,128], index: 16, kind: output, shape index: {}]   ;;  %s3486_s13 = inlined_call_operand.vmem [shape: f32[2,64], index: 13, kind: input, shape index: {}]   ;;  %s3487_s15 = inlined_call_operand.vmem [shape: f32[1,2], index: 15, kind: input, shape index: {}]  }
   0x1   :  { %3493 = sst [smem:[#allocation6_spill]] %s3471_s1  ;;  %2472 = vmatprep.subr.bf16.mxu0 %v2672_v0  ;;  %2476 = vmatprep.mubr.msk.bf16.mxu0 %vm3490_vm0, %v2672_v0  ;;  %v2589_v3 = vld [vmem:[%s3472_s0] sm:$0xff]   ;;  %v2590_v4 = vld [vmem:[%s3472_s0 + $0x8] sm:$0xff]   ;;  %v2591_v5 = vld [vmem:[%s3472_s0 + $0x10] sm:$0xff]   ;;  %vm3492_vm3 = vsmask.f32 256 }
   0x2   :  { %s3494_s23 = sld [smem:[#allocation6_spill]]  ;;  %v2592_v6 = vld [vmem:[%s3472_s0 + $0x18] sm:$0xff]   ;;  %v2593_v7 = vld [vmem:[%s3472_s0 + $0x20] sm:$0xff]   ;;  %v2594_v8 = vld [vmem:[%s3472_s0 + $0x28] sm:$0xff]   ;;  %vm432_vm4 = vcmask 122880   ;;  %s2676_s20 = smov 48  }
   0x3   :  { %v2595_v9 = vld [vmem:[%s3472_s0 + $0x30] sm:$0xff]   ;;  %v2596_v10 = vld [vmem:[%s3472_s0 + $0x38] sm:$0xff]   ;;  %v2597_v11 = vld [vmem:[%s3472_s0 + $0x40] sm:$0xff]   ;;  %s2677_s21 = smov 64   ;;  %s2678_s22 = smov 96   ;;  %vm483_vm6 = vcmask 1042432  }
   0x4   :  { %v2598_v12 = vld [vmem:[%s3472_s0 + $0x48] sm:$0xff]   ;;  %v2599_v13 = vld [vmem:[%s3472_s0 + $0x50] ss:$0 sps:$4 sm:$0x11]   ;;  %v2848_v14 = vld [vmem:[%s3473_s2] ss:$0 sm:$0xff] }
   0x5   :  { %vm2858_vm5 = vmand %vm432_vm4, %vm3492_vm3  ;;  %s2674_s0 = smov 16   ;;  %s2675_s2 = smov 32   ;;  %vm484_vm7 = vcmask 1046532   ;;  %vm445_vm8 = vsmask.f32 3328  ;;  %vm545_vm14 = vcmask 1041408  }
   0x6   :  { %s2680_s24 = smov 112   ;;  %vm446_vm9 = vsmask.f32 7440  ;;  %vm2946_vm10 = vmor %vm483_vm6, %vm484_vm7  ;;  %vm506_vm12 = vsmask.f32 2304  ;;  %vm546_vm15 = vcmask 1045508  }
   0x7   :  { %vm2955_vm11 = vmor %vm445_vm8, %vm446_vm9  ;;  %vm507_vm13 = vsmask.f32 6416  ;;  %vm607_vm7 = vcmask 1040384   ;;  %vm569_vm8 = vsmask.f32 5392  ;;  %2197 = vst [vmem:[%s3485_s16] sm:$0x3] %v2672_v0 }
   0x8   :  { %v2587_v1 = vld [vmem:[%s3494_s23] sm:$0xff]   ;;  %v2588_v2 = vld [vmem:[%s3494_s23 + $0x8] sm:$0xff]   ;;  %s2679_s23 = smov 80   ;;  %vm2977_vm6 = vmor %vm545_vm14, %vm546_vm15  ;;  %vm608_vm14 = vcmask 1044484   ;;  %s2685_s1 = smov 4  }
   0x9   :  { %2473 = vmatpush3.bf16.msra.mxu0 %v2587_v1  ;;  %vm2991_vm9 = vmor %vm506_vm12, %vm507_vm13  ;;  %vm668_vm13 = vsmask.f32 7938 }
   0xa   :  { %2474 = vmatprep.subr.bf16.mxu0 %v2672_v0  ;;  %vm3008_vm12 = vmor %vm607_vm7, %vm608_vm14  ;;  %vm561_vm14 = vcmask 647680  }
   0xd   :  { %2475 = vmatpush3.bf16.msra.mxu0 %v2588_v2 }
  0x10   :  { %2477 = vmatmul.mubr.msk.bf16.vlgmr.msra.gmra.mrb[0].mxu0 %vm3489_vm1, %v2589_v3 }
  0x11   :  { %2480 = vmatprep.mubr.msk.bf16.mxu0 %vm3490_vm0, %v2672_v0 }
  0x18   :  { %2481 = vmatmul.mubr.msk.bf16.gmra.mrb[4].mxu0 %vm3489_vm1, %v2590_v4 }
  0x19   :  { %2484 = vmatprep.mubr.msk.bf16.mxu0 %vm3490_vm0, %v2672_v0 }
  0x20   :  { %2485 = vmatmul.mubr.msk.bf16.gmra.mrb[8].mxu0 %vm3489_vm1, %v2591_v5 }
  0x21   :  { %2488 = vmatprep.mubr.msk.bf16.mxu0 %vm3490_vm0, %v2672_v0 }
  0x28   :  { %2489 = vmatmul.mubr.msk.bf16.gmra.mrb[12].mxu0 %vm3489_vm1, %v2592_v6 }
  0x29   :  { %2492 = vmatprep.mubr.msk.bf16.mxu0 %vm3490_vm0, %v2672_v0 }
  0x30   :  { %2493 = vmatmul.mubr.msk.bf16.gmra.mrb[16].mxu0 %vm3489_vm1, %v2593_v7 }
  0x31   :  { %2496 = vmatprep.mubr.msk.bf16.mxu0 %vm3490_vm0, %v2672_v0 }
  0x38   :  { %2497 = vmatmul.mubr.msk.bf16.gmra.mrb[20].mxu0 %vm3489_vm1, %v2594_v8 }
  0x39   :  { %2500 = vmatprep.mubr.msk.bf16.mxu0 %vm3490_vm0, %v2672_v0 }
  0x40   :  { %2501 = vmatmul.mubr.msk.bf16.gmra.mrb[24].mxu0 %vm3489_vm1, %v2595_v9 }
  0x41   :  { %2504 = vmatprep.mubr.msk.bf16.mxu0 %vm3490_vm0, %v2672_v0 }
  0x48   :  { %2505 = vmatmul.mubr.msk.bf16.gmra.mrb[28].mxu0 %vm3489_vm1, %v2596_v10 }
  0x49   :  { %2508 = vmatprep.mubr.msk.bf16.mxu0 %vm3490_vm0, %v2672_v0 }
  0x50   :  { %2509 = vmatmul.mubr.msk.bf16.gmra.mrb[32].mxu0 %vm3489_vm1, %v2597_v11 }
  0x51   :  { %2512 = vmatprep.mubr.msk.bf16.mxu0 %vm3490_vm0, %v2672_v0 }
  0x58   :  { %2513 = vmatmul.mubr.msk.bf16.gmra.mrb[36].mxu0 %vm3489_vm1, %v2598_v12 }
  0x59   :  { %2516 = vmatprep.mubr.msk.bf16.mxu0 %vm3490_vm0, %v2672_v0  ;;  %vm596_vm0 = vcmask 781952  }
  0x60   :  { %2517 = vmatmul.mubr.msk.bf16.gmra.mrb[40].mxu0 %vm3489_vm1, %v2599_v13 }
  0xe3   :  { %v219_v15 = vpop.f32.mrb[0].mxu0 }
  0xe4   :  { %v220_v16 = vadd.f32 %v2848_v14, %v219_v15  ;;  %v2478_v17 = vpop.f32.mrb[1].mxu0 }
  0xe5   :  { %v222_v18 = vpop.f32.mrb[2].mxu0 }
  0xe6   :  { %v305_v19 = vmax.f32 %v220_v16, 0.0  ;;  %v223_v20 = vadd.f32 %v2848_v14, %v222_v18  ;;  %v2479_v21 = vpop.f32.mrb[3].mxu0 }
  0xe8   :  { %v2374_v22 = vpack.c.bf16 %v305_v19, %v305_v19  ;;  %v306_v23 = vmax.f32 %v223_v20, 0.0 }
  0xea   :  { %412 = vst.msk [vmem:[#allocation2] sm:$0xf] %vm411_vm2, %v2374_v22  ;;  %v2375_v24 = vpack.c.bf16 %v306_v23, %v306_v23 }
  0xeb   :  { %v227_v25 = vpop.f32.mrb[4].mxu0 }
  0xec   :  { %413 = vst.msk [vmem:[#allocation2 + $0x4] sm:$0xf] %vm411_vm2, %v2375_v24  ;;  %v228_v26 = vadd.f32 %v2848_v14, %v227_v25  ;;  %v2482_v27 = vpop.f32.mrb[5].mxu0 }
  0xed   :  { %v230_v28 = vpop.f32.mrb[6].mxu0 }
  0xee   :  { %v307_v29 = vmax.f32 %v228_v26, 0.0  ;;  %v231_v30 = vadd.f32 %v2848_v14, %v230_v28  ;;  %v2483_v31 = vpop.f32.mrb[7].mxu0 }
  0xf0   :  { %v2376_v32 = vpack.c.bf16 %v307_v29, %v307_v29  ;;  %v308_v33 = vmax.f32 %v231_v30, 0.0 }
  0xf1   :  { %v434_v36 = vld [vmem:[#allocation2] sm:$0xf] }
  0xf2   :  { %414 = vst.msk [vmem:[#allocation2 + $0x8] sm:$0xf] %vm411_vm2, %v2376_v32  ;;  %v2377_v37 = vpack.c.bf16 %v308_v33, %v308_v33  ;;  %436 = vst.msk [vmem:[#allocation3] sm:$0xf] %vm411_vm2, %v434_v36 }
  0xf3   :  { %v235_v38 = vpop.f32.mrb[8].mxu0  ;;  %v435_v39 = vld [vmem:[#allocation2 + $0x4] sm:$0x1] }
  0xf4   :  { %415 = vst.msk [vmem:[#allocation2 + $0xc] sm:$0xf] %vm411_vm2, %v2377_v37  ;;  %v236_v40 = vadd.f32 %v2848_v14, %v235_v38  ;;  %v2486_v41 = vpop.f32.mrb[9].mxu0  ;;  %v441_v42 = vsel %vm2858_vm5, %v435_v39, %v440_v35 }
  0xf5   :  { %v238_v43 = vpop.f32.mrb[10].mxu0  ;;  %442 = vst [vmem:[#allocation3 + $0x8] sm:$0x1] %v441_v42 }
  0xf6   :  { %v309_v44 = vmax.f32 %v236_v40, 0.0  ;;  %v239_v45 = vadd.f32 %v2848_v14, %v238_v43  ;;  %v2487_v46 = vpop.f32.mrb[11].mxu0 }
  0xf8   :  { %v2378_v47 = vpack.c.bf16 %v309_v44, %v309_v44  ;;  %v310_v48 = vmax.f32 %v239_v45, 0.0 }
  0xf9   :  { %v2869_v49 = vld [vmem:[#allocation2 + $0x8] sm:$0x1] }
  0xfa   :  { %416 = vst.msk [vmem:[#allocation2 + $0x10] sm:$0xf] %vm411_vm2, %v2378_v47  ;;  %v2379_v50 = vpack.c.bf16 %v310_v48, %v310_v48  ;;  %v462_v51 = vshrl.u32 %v2869_v49, 16 }
  0xfb   :  { %v243_v52 = vpop.f32.mrb[12].mxu0  ;;  %v2873_v53 = vld [vmem:[#allocation2 + $0xc] sm:$0x3] }
  0xfc   :  { %417 = vst.msk [vmem:[#allocation2 + $0x14] sm:$0xf] %vm411_vm2, %v2379_v50  ;;  %v244_v54 = vadd.f32 %v2848_v14, %v243_v52  ;;  %468 = vrot.lane.b32.xlu0 %v462_v51, %s2674_s0  ;;  %v488_v55 = vrot.slane %v2873_v53, 5  ;;  %v2490_v56 = vpop.f32.mrb[13].mxu0  ;;  %v662_v51 = vld [vmem:[#allocation3 + $0xc] sm:$0x1] }
  0xfd   :  { %v246_v57 = vpop.f32.mrb[14].mxu0 }
  0xfe   :  { %v311_v58 = vmax.f32 %v244_v54, 0.0  ;;  %v490_v59 = vrot.slane %v488_v55, 4  ;;  %v247_v60 = vadd.f32 %v2848_v14, %v246_v57  ;;  %v2491_v61 = vpop.f32.mrb[15].mxu0 }
 0x100   :  { %v2380_v62 = vpack.c.bf16 %v311_v58, %v311_v58  ;;  %493 = vrot.lane.b32.xlu0 %v490_v59, %s2675_s2  ;;  %v312_v63 = vmax.f32 %v247_v60, 0.0 }
 0x101   :  { %v2883_v1 = vld [vmem:[#allocation2 + $0x10] sm:$0x3] }
 0x102   :  { %418 = vst.msk [vmem:[#allocation2 + $0x18] sm:$0xf] %vm411_vm2, %v2380_v62  ;;  %v2381_v2 = vpack.c.bf16 %v312_v63, %v312_v63  ;;  %v519_v3 = vshrl.u32 %v2883_v1, 16 }
 0x103   :  { %v251_v4 = vpop.f32.mrb[16].mxu0  ;;  %v2887_v5 = vld [vmem:[#allocation2 + $0x14] sm:$0x7] }
 0x104   :  { %419 = vst.msk [vmem:[#allocation2 + $0x1c] sm:$0xf] %vm411_vm2, %v2381_v2  ;;  %v2890_v6 = vrot.slane %v519_v3, 5  ;;  %v252_v7 = vadd.f32 %v2848_v14, %v251_v4  ;;  %v550_v8 = vrot.slane %v2887_v5, 6  ;;  %v2494_v9 = vpop.f32.mrb[17].mxu0 }
 0x105   :  { %v254_v10 = vpop.f32.mrb[18].mxu0 }
 0x106   :  { %v527_v11 = vrot.slane %v2890_v6, 4  ;;  %v313_v12 = vmax.f32 %v252_v7, 0.0  ;;  %v2495_v13 = vpop.f32.mrb[19].mxu0  ;;  %v255_v15 = vadd.f32 %v2848_v14, %v254_v10  ;;  %v552_v17 = vrot.slane %v550_v8, 4 }
 0x108   :  { %530 = vrot.lane.b32.xlu1 %v527_v11, %s2676_s20  ;;  %v2382_v16 = vpack.c.bf16 %v313_v12, %v313_v12  ;;  %v314_v18 = vmax.f32 %v255_v15, 0.0 }
 0x109   :  { %v2899_v19 = vld [vmem:[#allocation2 + $0x18] sm:$0x7] }
 0x10a   :  { %420 = vst.msk [vmem:[#allocation2 + $0x20] sm:$0xf] %vm411_vm2, %v2382_v16  ;;  %v581_v20 = vshrl.u32 %v2899_v19, 16  ;;  %v2383_v21 = vpack.c.bf16 %v314_v18, %v314_v18 }
 0x10b   :  { %v259_v22 = vpop.f32.mrb[20].mxu0  ;;  %v2903_v23 = vld [vmem:[#allocation2 + $0x1c] sm:$0xf] }
 0x10c   :  { %555 = vrot.lane.b32.xlu1 %v552_v17, %s2677_s21  ;;  %v260_v24 = vadd.f32 %v2848_v14, %v259_v22  ;;  %v2498_v25 = vpop.f32.mrb[21].mxu0  ;;  %v612_v26 = vrot.slane %v2903_v23, 7  ;;  %v2908_v27 = vrot.slane %v581_v20, 6  ;;  %421 = vst.msk [vmem:[#allocation2 + $0x24] sm:$0xf] %vm411_vm2, %v2383_v21 }
 0x10d   :  { %v262_v28 = vpop.f32.mrb[22].mxu0 }
 0x10e   :  { %v315_v29 = vmax.f32 %v260_v24, 0.0  ;;  %v263_v30 = vadd.f32 %v2848_v14, %v262_v28  ;;  %v2499_v31 = vpop.f32.mrb[23].mxu0  ;;  %v614_v32 = vrot.slane %v612_v26, 4  ;;  %v589_v33 = vrot.slane %v2908_v27, 4 }
 0x110   :  { %v2384_v35 = vpack.c.bf16 %v315_v29, %v315_v29  ;;  %v316_v36 = vmax.f32 %v263_v30, 0.0  ;;  %617 = vrot.lane.b32.xlu1 %v614_v32, %s2678_s22  ;;  %592 = vrot.lane.b32.xlu0 %v589_v33, %s2679_s23 }
 0x111   :  { %v2917_v37 = vld [vmem:[#allocation2 + $0x20] sm:$0xf] }
 0x112   :  { %422 = vst.msk [vmem:[#allocation2 + $0x28] sm:$0xf] %vm411_vm2, %v2384_v35  ;;  %v2385_v38 = vpack.c.bf16 %v316_v36, %v316_v36  ;;  %v638_v39 = vshrl.u32 %v2917_v37, 16 }
 0x113   :  { %v267_v40 = vpop.f32.mrb[24].mxu0  ;;  %v659_v44 = vld [vmem:[#allocation2 + $0x24] sm:$0xf] }
 0x114   :  { %423 = vst.msk [vmem:[#allocation2 + $0x2c] sm:$0xf] %vm411_vm2, %v2385_v38  ;;  %v268_v41 = vadd.f32 %v2848_v14, %v267_v40  ;;  %v2502_v42 = vpop.f32.mrb[25].mxu0  ;;  %v2923_v43 = vrot.slane %v638_v39, 7  ;;  %661 = vst.msk [vmem:[#allocation3 + $0x4] sm:$0xf] %vm411_vm2, %v659_v44 }
 0x115   :  { %v270_v45 = vpop.f32.mrb[26].mxu0 }
 0x116   :  { %v317_v46 = vmax.f32 %v268_v41, 0.0  ;;  %v271_v47 = vadd.f32 %v2848_v14, %v270_v45  ;;  %v2503_v48 = vpop.f32.mrb[27].mxu0  ;;  %v645_v50 = vrot.slane %v2923_v43, 4 }
 0x118   :  { %v2386_v52 = vpack.c.bf16 %v317_v46, %v317_v46  ;;  %v318_v54 = vmax.f32 %v271_v47, 0.0  ;;  %648 = vrot.lane.b32.xlu0 %v645_v50, %s2680_s24  ;;  %v443_v46 = vld [vmem:[#allocation2 + $0x4] sm:$0xf] }
 0x119   :  { %v660_v56 = vld [vmem:[#allocation2 + $0x28] sm:$0x1] }
 0x11a   :  { %424 = vst.msk [vmem:[#allocation2 + $0x30] sm:$0xf] %vm411_vm2, %v2386_v52  ;;  %v2387_v57 = vpack.c.bf16 %v318_v54, %v318_v54  ;;  %v663_v58 = vsel %vm2858_vm5, %v660_v56, %v662_v51  ;;  %vm568_vm5 = vsmask.f32 1280 }
 0x11b   :  { %v275_v59 = vpop.f32.mrb[28].mxu0  ;;  %v674_v60 = vld [vmem:[#allocation2 + $0x2c] sm:$0xe]  ;;  %664 = vst [vmem:[#allocation3 + $0xc] sm:$0x1] %v663_v58  ;;  %v452_v58 = vshll.u32 %v443_v46, 16  ;;  %vm3021_vm15 = vmor %vm568_vm5, %vm569_vm8 }
 0x11c   :  { %v666_v61 = vld [vmem:[#allocation2 + $0x2c] sm:$0x1]  ;;  %425 = vst.msk [vmem:[#allocation2 + $0x34] sm:$0xf] %vm411_vm2, %v2387_v57  ;;  %v276_v62 = vadd.f32 %v2848_v14, %v275_v59  ;;  %v2506_v63 = vpop.f32.mrb[29].mxu0  ;;  %v677_v2 = vshrl.u32 %v674_v60, 16  ;;  %vm3032_vm5 = vmand %vm411_vm2, %vm668_vm13 }
 0x11d   :  { %v680_v3 = vshll.u32 %v674_v60, 16  ;;  %673 = vst.msk [vmem:[#allocation3 + $0x10] sm:$0x1] %vm432_vm4, %v666_v61  ;;  %v278_v4 = vpop.f32.mrb[30].mxu0  ;;  %v449_v57 = vshrl.u32 %v443_v46, 16  ;;  %vm536_vm8 = vcmask 516480  }
 0x11e   :  { %v319_v7 = vmax.f32 %v276_v62, 0.0  ;;  %v279_v9 = vadd.f32 %v2848_v14, %v278_v4  ;;  %v2507_v10 = vpop.f32.mrb[31].mxu0  ;;  %v679_v34 = vrot.slane %v677_v2, 4 }
 0x11f   :  { %v682_v11 = vrot.slane %v680_v3, 5 }
 0x120   :  { %v2388_v12 = vpack.c.bf16 %v319_v7, %v319_v7  ;;  %v320_v13 = vmax.f32 %v279_v9, 0.0 }
 0x121   :  { %v683_v15 = vor.u32 %v682_v11, %v679_v34  ;;  %v708_v16 = vld [vmem:[#allocation2 + $0x30] sm:$0xe] }
 0x122   :  { %v2936_v17 = vld [vmem:[#allocation2 + $0x30] sm:$0x3]  ;;  %426 = vst.msk [vmem:[#allocation2 + $0x38] sm:$0xf] %vm411_vm2, %v2388_v12  ;;  %v2389_v18 = vpack.c.bf16 %v320_v13, %v320_v13  ;;  %v2270_v20 = vrot.slane %v708_v16, 9 }
 0x123   :  { %v684_v21 = vrot.slane %v683_v15, 4  ;;  %v686_v22 = vshll.u32 %v2936_v17, 16  ;;  %v283_v24 = vpop.f32.mrb[32].mxu0  ;;  %v2940_v25 = vld [vmem:[#allocation2 + $0x34] sm:$0x3] }
 0x124   :  { %v730_v28 = vld [vmem:[#allocation2 + $0x34] sm:$0xc]  ;;  %427 = vst.msk [vmem:[#allocation2 + $0x3c] sm:$0xf] %vm411_vm2, %v2389_v18  ;;  %v284_v29 = vadd.f32 %v2848_v14, %v283_v24  ;;  %v2510_v30 = vpop.f32.mrb[33].mxu0  ;;  %v714_v32 = vrot.slane %v2940_v25, 5 }
 0x125   :  { %v2951_v33 = vrot.slane %v686_v22, 5  ;;  %v733_v35 = vshrl.u32 %v730_v28, 16  ;;  %v286_v36 = vpop.f32.mrb[34].mxu0  ;;  %v736_v39 = vshll.u32 %v730_v28, 16  ;;  %v504_v24 = vld [vmem:[#allocation2 + $0xc] sm:$0xe] }
 0x126   :  { %v321_v40 = vmax.f32 %v284_v29, 0.0  ;;  %v287_v41 = vadd.f32 %v2848_v14, %v286_v36  ;;  %v2511_v42 = vpop.f32.mrb[35].mxu0  ;;  %v715_v44 = vsel %vm2946_vm10, %v2270_v20, %v714_v32  ;;  %v451_v36 = vrot.slane %v449_v57, 4 }
 0x127   :  { %v689_v45 = vsel %vm2955_vm11, %v684_v21, %v2951_v33  ;;  %717 = vrot.lane.b32.xlu0 %v715_v44, %s2675_s2  ;;  %v735_v47 = vrot.slane %v733_v35, 5  ;;  %v738_v48 = vrot.slane %v736_v39, 6  ;;  %v454_v42 = vrot.slane %v452_v58, 5  ;;  %v566_v44 = vld [vmem:[#allocation2 + $0x14] sm:$0xc] }
 0x128   :  { %695 = vrot.lane.b32.xlu1 %v689_v45, %s2674_s0  ;;  %v2390_v50 = vpack.c.bf16 %v321_v40, %v321_v40  ;;  %v322_v51 = vmax.f32 %v287_v41, 0.0  ;;  %v458_v57 = vshll.u32 %v2869_v49, 16  ;;  %v572_v58 = vshrl.u32 %v566_v44, 16 }
 0x129   :  { %v764_v52 = vld [vmem:[#allocation2 + $0x38] sm:$0xc]  ;;  %v739_v56 = vor.u32 %v738_v48, %v735_v47  ;;  %v510_v48 = vshrl.u32 %v504_v24, 16  ;;  %v455_v49 = vor.u32 %v454_v42, %v451_v36 }
 0x12a   :  { %v731_v54 = vld [vmem:[#allocation2 + $0x38] sm:$0x7]  ;;  %428 = vst.msk [vmem:[#allocation2 + $0x40] sm:$0xf] %vm411_vm2, %v2390_v50  ;;  %v2391_v59 = vpack.c.bf16 %v322_v51, %v322_v51  ;;  %v2271_v60 = vrot.slane %v764_v52, 10  ;;  %v513_v50 = vshll.u32 %v504_v24, 16 }
 0x12b   :  { %v742_v61 = vshrl.u32 %v731_v54, 16  ;;  %v745_v62 = vshll.u32 %v731_v54, 16  ;;  %v291_v63 = vpop.f32.mrb[36].mxu0  ;;  %v2970_v2 = vld [vmem:[#allocation2 + $0x3c] sm:$0x7]  ;;  %v740_v3 = vrot.slane %v739_v56, 4 }
 0x12c   :  { %v786_v4 = vld [vmem:[#allocation2 + $0x3c] sm:$0x8]  ;;  %429 = vst.msk [vmem:[#allocation2 + $0x44] sm:$0xf] %vm411_vm2, %v2391_v59  ;;  %v292_v7 = vadd.f32 %v2848_v14, %v291_v63  ;;  %v2514_v9 = vpop.f32.mrb[37].mxu0  ;;  %v770_v10 = vrot.slane %v2970_v2, 6 }
 0x12d   :  { %v744_v34 = vrot.slane %v742_v61, 5  ;;  %v747_v11 = vrot.slane %v745_v62, 6  ;;  %v294_v12 = vpop.f32.mrb[38].mxu0  ;;  %v789_v15 = vshrl.u32 %v786_v4, 16  ;;  %v792_v16 = vshll.u32 %v786_v4, 16  ;;  %v2600_v2 = vld [vmem:[%s3474_s3] sm:$0xff]  }
 0x12e   :  { %v323_v18 = vmax.f32 %v292_v7, 0.0  ;;  %v295_v20 = vadd.f32 %v2848_v14, %v294_v12  ;;  %v771_v21 = vsel %vm2977_vm6, %v2271_v60, %v770_v10  ;;  %v2515_v28 = vpop.f32.mrb[39].mxu0  ;;  %v522_v59 = vshll.u32 %v2883_v1, 16  ;;  %v479_v7 = vld [vmem:[#allocation2 + $0x8] sm:$0xe] }
 0x12f   :  { %v2986_v22 = vor.u32 %v747_v11, %v744_v34  ;;  %773 = vrot.lane.b32.xlu0 %v771_v21, %s2677_s21  ;;  %v791_v30 = vrot.slane %v789_v15, 6  ;;  %v794_v35 = vrot.slane %v792_v16, 7  ;;  %v575_v61 = vshll.u32 %v566_v44, 16  ;;  %v541_v21 = vld [vmem:[#allocation2 + $0x10] sm:$0xc] }
 0x130   :  { %v2392_v39 = vpack.c.bf16 %v323_v18, %v323_v18  ;;  %v324_v40 = vmax.f32 %v295_v20, 0.0  ;;  %v512_v1 = vrot.slane %v510_v48, 5  ;;  %v515_v34 = vrot.slane %v513_v50, 6 }
 0x131   :  { %v749_v41 = vsel %vm2991_vm9, %v740_v3, %v2986_v22  ;;  %v820_v45 = vld [vmem:[#allocation2 + $0x40] sm:$0x8]  ;;  %v795_v47 = vor.u32 %v794_v35, %v791_v30  ;;  %v460_v15 = vrot.slane %v458_v57, 5  ;;  %v524_v16 = vrot.slane %v522_v59, 6 }
 0x132   :  { %751 = vrot.lane.b32.xlu1 %v749_v41, %s2676_s20  ;;  %v787_v46 = vld [vmem:[#allocation2 + $0x40] sm:$0xf]  ;;  %430 = vst.msk [vmem:[#allocation2 + $0x48] sm:$0xf] %vm411_vm2, %v2392_v39  ;;  %v2393_v51 = vpack.c.bf16 %v324_v40, %v324_v40  ;;  %v2272_v52 = vrot.slane %v820_v45, 11  ;;  %v2266_v20 = vrot.slane %v479_v7, 9  ;;  %v516_v39 = vor.u32 %v515_v34, %v512_v1 }
 0x133   :  { %v798_v54 = vshrl.u32 %v787_v46, 16  ;;  %v801_v56 = vshll.u32 %v787_v46, 16  ;;  %v3002_v60 = vld [vmem:[#allocation2 + $0x44] sm:$0xf]  ;;  %v796_v63 = vrot.slane %v795_v47, 4  ;;  %v584_v24 = vshll.u32 %v2899_v19, 16 }
 0x134   :  { %431 = vst.msk [vmem:[#allocation2 + $0x4c] sm:$0xf] %vm411_vm2, %v2393_v51  ;;  %v826_v62 = vrot.slane %v3002_v60, 7  ;;  %v574_v30 = vrot.slane %v572_v58, 6  ;;  %v577_v35 = vrot.slane %v575_v61, 7  ;;  %v456_v36 = vrot.slane %v455_v49, 4 }
 0x135   :  { %v800_v3 = vrot.slane %v798_v54, 6  ;;  %v803_v4 = vrot.slane %v801_v56, 7  ;;  %v871_v41 = vld [vmem:[#allocation3 + $0xc] sm:$0xf]  ;;  %v489_v19 = vsel %vm2946_vm10, %v2266_v20, %v488_v55  ;;  %v2267_v42 = vrot.slane %v541_v21, 10  ;;  %v2601_v60 = vld [vmem:[%s3474_s3 + $0x8] sm:$0xff]  }
 0x136   :  { %v827_v11 = vsel %vm3008_vm12, %v2272_v52, %v826_v62  ;;  %v461_v45 = vsel %vm2955_vm11, %v456_v36, %v460_v15  ;;  %v603_v46 = vld [vmem:[#allocation2 + $0x18] sm:$0x8]  ;;  %v628_v47 = vld [vmem:[#allocation2 + $0x1c] sm:$0x8]  ;;  %v525_v50 = vor.u32 %v524_v16, %v2890_v6  ;;  %v578_v51 = vor.u32 %v577_v35, %v574_v30  ;;  %v2602_v34 = vld [vmem:[%s3474_s3 + $0x10] sm:$0xff]  }
 0x137   :  { %v3016_v12 = vor.u32 %v803_v4, %v800_v3  ;;  %829 = vrot.lane.b32.xlu0 %v827_v11, %s2678_s22  ;;  %v586_v52 = vrot.slane %v584_v24, 7  ;;  %v517_v55 = vrot.slane %v516_v39, 4  ;;  %v551_v38 = vsel %vm2977_vm6, %v2267_v42, %v550_v8  ;;  %v2603_v20 = vld [vmem:[%s3474_s3 + $0x18] sm:$0xff]   ;;  %v2605_v24 = vld [vmem:[%s3474_s3 + $0x28] sm:$0xff]   ;;  %v2606_v30 = vld [vmem:[%s3474_s3 + $0x30] sm:$0xff]  }
 0x138   :  { %v2268_v54 = vrot.slane %v603_v46, 11  ;;  %v633_v56 = vshrl.u32 %v628_v47, 16  ;;  %v641_v57 = vshll.u32 %v2917_v37, 16  ;;  %v690_v6 = vshrl.u32 %v2936_v17, 16  ;;  %v476_v35 = vld [vmem:[#allocation3 + $0x8] sm:$0x1] }
 0x139   :  { %v805_v28 = vsel %vm3021_vm15, %v796_v63, %v3016_v12  ;;  %v842_v44 = vld [vmem:[#allocation2 + $0x48] sm:$0xf]  ;;  %v526_v59 = vsel %vm2991_vm9, %v517_v55, %v525_v50  ;;  %v579_v58 = vrot.slane %v578_v51, 4  ;;  %v587_v61 = vor.u32 %v586_v52, %v2908_v27  ;;  %v2607_v39 = vld [vmem:[%s3474_s3 + $0x38] sm:$0xff]   ;;  %vm537_vm9 = vmand %vm536_vm8, %vm3492_vm3 }
 0x13a   :  { %807 = vrot.lane.b32.xlu1 %v805_v28, %s2679_s23  ;;  %v845_v31 = vshrl.u32 %v842_v44, 16  ;;  %vm630_vm2 = vsmask.f32 4368  ;;  %v848_v13 = vshll.u32 %v842_v44, 16  ;;  %v613_v8 = vsel %vm3008_vm12, %v2268_v54, %v612_v26  ;;  %vm562_vm12 = vmand %vm561_vm14, %vm3492_vm3 }
 0x13b   :  { %491 = vrot.lane.b32.xlu0 %v489_v19, %s2675_s2  ;;  %v869_v48 = vld [vmem:[#allocation2 + $0x4c] sm:$0xf]  ;;  %v2269_v37 = vrot.slane %v633_v56, 11  ;;  %v643_v63 = vor.u32 %v641_v57, %v2923_v43  ;;  %vm3065_vm10 = vmor %vm3492_vm3, %vm630_vm2  ;;  %v692_v27 = vrot.slane %v690_v6, 4  ;;  %v588_v29 = vsel %vm3021_vm15, %v579_v58, %v587_v61  ;;  %v2608_v19 = vld [vmem:[%s3474_s3 + $0x40] sm:$0xff]  }
 0x13c   :  { %v872_v53 = vsel %vm3032_vm5, %v869_v48, %v871_v41  ;;  %v847_v5 = vrot.slane %v845_v31, 7  ;;  %v716_v3 = vrot.slane %v714_v32, 4  ;;  %v772_v7 = vrot.slane %v770_v10, 4  ;;  %v843_v49 = vld [vmem:[#allocation2 + $0x4c] sm:$0x1] }
 0x13d   :  { %873 = vst [vmem:[#allocation3 + $0xc] sm:$0xf] %v872_v53  ;;  %v644_v26 = vsel %vm3065_vm10, %v2269_v37, %v643_v63  ;;  %v693_v43 = vor.u32 %v692_v27, %v2951_v33  ;;  %v750_v9 = vrot.slane %v2986_v22, 4  ;;  %v828_v33 = vrot.slane %v826_v62, 4  ;;  %v299_v62 = vpop.f32.mrb[40].mxu0 }
 0x13e   :  { %466 = vrot.lane.b32.xlu1 %v461_v45, %s2674_s0  ;;  %v850_v23 = vor.u32 %v848_v13, %v847_v5  ;;  %v806_v25 = vrot.slane %v3016_v12, 4  ;;  %v851_v32 = vrot.slane %v847_v5, 4  ;;  %v853_v1 = vshll.u32 %v843_v49, 16  ;;  %v2518_v12 = vpop.f32.mrb[41].mxu0  ;;  %v665_v63 = vld [vmem:[#allocation2 + $0x28] sm:$0xf] }
 0x13f   :  { %553 = vrot.lane.b32.xlu0 %v551_v38, %s2677_s21  ;;  %v694_v4 = vrot.slane %v693_v43, 4  ;;  %v2681_v10 = vmov 0   ;;  %v300_v11 = vadd.f32 %v2848_v14, %v299_v62  ;;  %v302_v15 = vpop.f32.mrb[42].mxu0  ;;  %v2604_v14 = vld [vmem:[%s3474_s3 + $0x20] sm:$0xff]   ;;  %vm474_vm11 = vcmask 254080  }
 0x140   :  { %979 = vmatprep.subr.bf16.mxu1 %v2681_v10  ;;  %v855_v22 = vsel %vm3065_vm10, %v851_v32, %v853_v1  ;;  %v2519_v18 = vpop.f32.mrb[43].mxu0  ;;  %vm475_vm6 = vmand %vm474_vm11, %vm3492_vm3  ;;  %vm598_vm15 = vcmask 778880   ;;  %vm623_vm10 = vcmask 910080  }
 0x141   :  { %980 = vmatpush1.bf16.msra.mxu1 %v2600_v2  ;;  %v325_v16 = vmax.f32 %v300_v11, 0.0  ;;  %vm599_vm2 = vmand %vm598_vm15, %vm3492_vm3 }
 0x142   :  { %528 = vrot.lane.b32.xlu1 %v526_v59, %s2676_s20  ;;  %981 = vmatprep.subr.bf16.mxu1 %v2681_v10 }
 0x143   :  { %615 = vrot.lane.b32.xlu0 %v613_v8, %s2678_s22  ;;  %v2394_v21 = vpack.c.bf16 %v325_v16, %v325_v16 }
 0x145   :  { %982 = vmatpush1.bf16.msra.mxu1 %v2601_v60  ;;  %433 = vst.msk [vmem:[#allocation2 + $0x50] sm:$0x1] %vm432_vm4, %v2394_v21 }
 0x146   :  { %590 = vrot.lane.b32.xlu1 %v588_v29, %s2679_s23  ;;  %983 = vmatprep.subr.bf16.mxu1 %v2681_v10 }
 0x147   :  { %646 = vrot.lane.b32.xlu0 %v644_v26, %s2680_s24 }
 0x149   :  { %984 = vmatpush1.bf16.msra.mxu1 %v2602_v34 }
 0x14a   :  { %856 = vrot.lane.b32.xlu1 %v850_v23, %s2680_s24  ;;  %985 = vmatprep.subr.bf16.mxu1 %v2681_v10 }
 0x14b   :  { %719 = vrot.lane.b32.xlu0 %v716_v3, %s2675_s2 }
 0x14c   :  { %v870_v28 = vld [vmem:[#allocation2 + $0x50] sm:$0x1] }
 0x14d   :  { %986 = vmatpush1.bf16.msra.mxu1 %v2603_v20  ;;  %874 = vst.msk [vmem:[#allocation3 + $0x14] sm:$0x1] %vm432_vm4, %v870_v28  ;;  %vm499_vm4 = vcmask 385280  }
 0x14e   :  { %697 = vrot.lane.b32.xlu1 %v694_v4, %s2674_s0  ;;  %987 = vmatprep.subr.bf16.mxu1 %v2681_v10  ;;  %vm500_vm7 = vmand %vm499_vm4, %vm3492_vm3 }
 0x14f   :  { %775 = vrot.lane.b32.xlu0 %v772_v7, %s2677_s21 }
 0x151   :  { %988 = vmatpush1.bf16.msra.mxu1 %v2604_v14 }
 0x152   :  { %753 = vrot.lane.b32.xlu1 %v750_v9, %s2676_s20  ;;  %989 = vmatprep.subr.bf16.mxu1 %v2681_v10 }
 0x153   :  { %831 = vrot.lane.b32.xlu0 %v828_v33, %s2678_s22 }
 0x155   :  { %990 = vmatpush1.bf16.msra.mxu1 %v2605_v24 }
 0x156   :  { %809 = vrot.lane.b32.xlu1 %v806_v25, %s2679_s23  ;;  %991 = vmatprep.subr.bf16.mxu1 %v2681_v10 }
 0x159   :  { %992 = vmatpush1.bf16.msra.mxu1 %v2606_v30 }
 0x15a   :  { %858 = vrot.lane.b32.xlu1 %v855_v22, %s2680_s24  ;;  %993 = vmatprep.subr.bf16.mxu1 %v2681_v10 }
 0x15d   :  { %994 = vmatpush1.bf16.msra.mxu1 %v2607_v39 }
 0x15e   :  { %995 = vmatprep.subr.bf16.mxu1 %v2681_v10 }
 0x161   :  { %996 = vmatpush1.bf16.msra.mxu1 %v2608_v19  ;;  %v2273_v19 = vld [vmem:[%s3475_s4] ss:$0 sm:$0xff] }
 0x16e   :  { %v469_v36 = vpop.permute.xlu0 %468 }
 0x16f   :  { %v477_v41 = vsel %vm475_vm6, %v469_v36, %v476_v35  ;;  %vm624_vm6 = vmand %vm623_vm10, %vm3492_vm3  ;;  %v2611_v36 = vld [vmem:[#allocation3 + $0x4] ss:$8 sps:$4 sm:$0xff]  }
 0x170   :  { %478 = vst [vmem:[#allocation3 + $0x8] sm:$0x1] %v477_v41 }
 0x172   :  { %v494_v44 = vpop.permute.xlu0 %493 }
 0x177   :  { %v501_v42 = vld [vmem:[#allocation3 + $0x8] sm:$0x1] }
 0x178   :  { %v502_v45 = vsel %vm500_vm7, %v494_v44, %v501_v42  ;;  %vm654_vm7 = vcmask 1041280  }
 0x179   :  { %503 = vst [vmem:[#allocation3 + $0x8] sm:$0x1] %v502_v45 }
 0x17a   :  { %v531_v47 = vpop.permute.xlu1 %530 }
 0x17e   :  { %v556_v51 = vpop.permute.xlu1 %555 }
 0x180   :  { %v538_v46 = vld [vmem:[#allocation3 + $0x8] sm:$0x1] }
 0x181   :  { %v539_v48 = vsel %vm537_vm9, %v531_v47, %v538_v46  ;;  %vm655_vm9 = vmand %vm654_vm7, %vm3492_vm3  ;;  %vm652_vm3 = vcmask 1044352  }
 0x182   :  { %540 = vst [vmem:[#allocation3 + $0x8] sm:$0x1] %v539_v48  ;;  %v593_v53 = vpop.permute.xlu0 %592  ;;  %v618_v54 = vpop.permute.xlu1 %617 }
 0x189   :  { %v563_v50 = vld [vmem:[#allocation3 + $0x8] sm:$0x1] }
 0x18a   :  { %v564_v52 = vsel %vm562_vm12, %v556_v51, %v563_v50  ;;  %v649_v38 = vpop.permute.xlu0 %648  ;;  %vm472_vm12 = vcmask 257152   ;;  %v2682_v50 = vmov 1966171168  }
 0x18b   :  { %565 = vst [vmem:[#allocation3 + $0x8] sm:$0x1] %v564_v52  ;;  %vm702_vm1 = vmand %vm472_vm12, %vm668_vm13  ;;  %v1064_v51 = vunpack.c.l.s4 %v2682_v50  ;;  %v1066_v52 = vlaneseq }
 0x192   :  { %v600_v55 = vld [vmem:[#allocation3 + $0x8] sm:$0x1] }
 0x193   :  { %v601_v31 = vsel %vm599_vm2, %v593_v53, %v600_v55  ;;  %vm497_vm2 = vcmask 388352  }
 0x194   :  { %602 = vst [vmem:[#allocation3 + $0x8] sm:$0x1] %v601_v31 }
 0x199   :  { %v718_v6 = vpop.permute.xlu0 %717 }
 0x19a   :  { %v696_v59 = vpop.permute.xlu1 %695 }
 0x19b   :  { %v625_v56 = vld [vmem:[#allocation3 + $0x8] sm:$0x1] }
 0x19c   :  { %v626_v57 = vsel %vm624_vm6, %v618_v54, %v625_v56  ;;  %vm534_vm6 = vcmask 519552   ;;  %v1065_v54 = vunpack.c.0.s8 %v1064_v51  ;;  %v3181_v56 = vshrl.u32 %v1066_v52, 7  ;;  %v2614_v52 = vld [vmem:[%s3476_s5 + $0x40] sm:$0xff]  }
 0x19d   :  { %627 = vst [vmem:[#allocation3 + $0x8] sm:$0x1] %v626_v57  ;;  %2411 = vmatprep.subr.bf16.mxu1 %v2614_v52 }
 0x1a1   :  { %v774_v58 = vpop.permute.xlu0 %773 }
 0x1a4   :  { %v656_v61 = vld [vmem:[#allocation3 + $0x8] sm:$0x1]  ;;  %v752_v13 = vpop.permute.xlu1 %751 }
 0x1a5   :  { %v657_v5 = vsel %vm655_vm9, %v649_v38, %v656_v61  ;;  %vm559_vm9 = vcmask 650752   ;;  %v3184_v61 = vsub.s32 %v1065_v54, %v3181_v56  ;;  %v2619_v54 = vld [vmem:[%s3476_s5 + $0x10] sm:$0xff]  }
 0x1a6   :  { %658 = vst [vmem:[#allocation3 + $0x8] sm:$0x1] %v657_v5 }
 0x1a9   :  { %v3147_v8 = vpop.permute.xlu0 %829 }
 0x1ac   :  { %v808_v37 = vpop.permute.xlu1 %807 }
 0x1ad   :  { %v670_v17 = vld [vmem:[#allocation3 + $0x8] sm:$0xf]  ;;  %v492_v27 = vpop.permute.xlu0 %491 }
 0x1ae   :  { %v671_v29 = vsel %vm3032_vm5, %v665_v63, %v670_v17  ;;  %vm621_vm5 = vcmask 913152  }
 0x1af   :  { %672 = vst [vmem:[#allocation3 + $0x8] sm:$0xf] %v671_v29 }
 0x1b0   :  { %v467_v23 = vpop.permute.xlu1 %466 }
 0x1b1   :  { %473 = vst.msk [vmem:[#allocation3] sm:$0xf] %vm472_vm12, %v467_v23  ;;  %v554_v26 = vpop.permute.xlu0 %553  ;;  %vm724_vm12 = vmand %vm497_vm2, %vm668_vm13 }
 0x1b2   :  { %498 = vst.msk [vmem:[#allocation3] sm:$0xf] %vm497_vm2, %v492_v27 }
 0x1b4   :  { %v529_v43 = vpop.permute.xlu1 %528 }
 0x1b5   :  { %535 = vst.msk [vmem:[#allocation3] sm:$0xf] %vm534_vm6, %v529_v43  ;;  %v616_v3 = vpop.permute.xlu0 %615 }
 0x1b6   :  { %560 = vst.msk [vmem:[#allocation3] sm:$0xf] %vm559_vm9, %v554_v26  ;;  %v703_v40 = vld [vmem:[#allocation3 + $0x8] sm:$0xf]  ;;  %v1241_v26 = vld [vmem:[#allocation5 + $0x2] sm:$0x1] }
 0x1b7   :  { %v704_v4 = vsel %vm702_vm1, %v696_v59, %v703_v40  ;;  %vm758_vm1 = vmand %vm534_vm6, %vm668_vm13  ;;  %vm1078_vm6 = vcmask 516352  }
 0x1b8   :  { %v591_v7 = vpop.permute.xlu1 %590  ;;  %705 = vst [vmem:[#allocation3 + $0x8] sm:$0xf] %v704_v4 }
 0x1b9   :  { %597 = vst.msk [vmem:[#allocation3] sm:$0xf] %vm596_vm0, %v591_v7  ;;  %v647_v9 = vpop.permute.xlu0 %646 }
 0x1ba   :  { %622 = vst.msk [vmem:[#allocation3] sm:$0xf] %vm621_vm5, %v616_v3  ;;  %v1156_v3 = vld [vmem:[#allocation5 + $0x1] sm:$0x1] }
 0x1bb   :  { %653 = vst.msk [vmem:[#allocation3] sm:$0xf] %vm652_vm3, %v647_v9 }
 0x1bc   :  { %v857_v33 = vpop.permute.xlu1 %856 }
 0x1bd   :  { %v720_v49 = vpop.permute.xlu0 %719 }
 0x1bf   :  { %v725_v25 = vld [vmem:[#allocation3 + $0x8] sm:$0xf] }
 0x1c0   :  { %v698_v32 = vpop.permute.xlu1 %697  ;;  %v726_v1 = vsel %vm724_vm12, %v718_v6, %v725_v25  ;;  %vm1103_vm12 = vcmask 778752  }
 0x1c1   :  { %707 = vst.msk [vmem:[#allocation3 + $0x10] sm:$0x1] %vm474_vm11, %v698_v32  ;;  %727 = vst [vmem:[#allocation3 + $0x8] sm:$0xf] %v726_v1  ;;  %v776_v2 = vpop.permute.xlu0 %775 }
 0x1c2   :  { %729 = vst.msk [vmem:[#allocation3 + $0x10] sm:$0x1] %vm499_vm4, %v720_v49  ;;  %vm780_vm11 = vmand %vm559_vm9, %vm668_vm13 }
 0x1c3   :  { %vm814_vm4 = vmand %vm596_vm0, %vm668_vm13  ;;  %vm1043_vm0 = vcmask 257024  }
 0x1c4   :  { %v754_v22 = vpop.permute.xlu1 %753 }
 0x1c5   :  { %763 = vst.msk [vmem:[#allocation3 + $0x10] sm:$0x1] %vm536_vm8, %v754_v22  ;;  %v832_v60 = vpop.permute.xlu0 %831  ;;  %vm836_vm8 = vmand %vm621_vm5, %vm668_vm13 }
 0x1c6   :  { %785 = vst.msk [vmem:[#allocation3 + $0x10] sm:$0x1] %vm561_vm14, %v776_v2  ;;  %vm863_vm14 = vmand %vm652_vm3, %vm668_vm13  ;;  %vm1046_vm3 = vcmask 253952  }
 0x1c7   :  { %vm3208_vm2 = vmand %vm1046_vm3, %vm668_vm13 }
 0x1c8   :  { %v810_v62 = vpop.permute.xlu1 %809  ;;  %v759_v34 = vld [vmem:[#allocation3 + $0x8] sm:$0xf] }
 0x1c9   :  { %819 = vst.msk [vmem:[#allocation3 + $0x10] sm:$0x1] %vm598_vm15, %v810_v62  ;;  %v760_v11 = vsel %vm758_vm1, %v752_v13, %v759_v34  ;;  %vm972_vm15 = vcmask 130048  }
 0x1ca   :  { %841 = vst.msk [vmem:[#allocation3 + $0x10] sm:$0x1] %vm623_vm10, %v832_v60  ;;  %761 = vst [vmem:[#allocation3 + $0x8] sm:$0xf] %v760_v11  ;;  %2287 = vmatprep.mubr.msk.bf16.mxu1 %vm972_vm15, %v2611_v36  ;;  %vm3513_vm10 = vsmask.f32 256 }
 0x1cb   :  { %vm3518_vm9 = vmmov %vm3513_vm10 }
 0x1cc   :  { %v859_v12 = vpop.permute.xlu1 %858  ;;  %vm1079_vm5 = vmand %vm1078_vm6, %vm3518_vm9 }
 0x1cd   :  { %868 = vst.msk [vmem:[#allocation3 + $0x10] sm:$0x1] %vm654_vm7, %v859_v12  ;;  %vm3188_vm7 = vmand %vm1046_vm3, %vm3513_vm10  ;;  %vm3522_vm10 = vcmask 261120  }
 0x1ce   :  { %vm3519_vm1 = vmmov %vm3518_vm9  ;;  %vm2213_vm9 = vcmask 42016  }
 0x1d1   :  { %v781_v15 = vld [vmem:[#allocation3 + $0x8] sm:$0xf] }
 0x1d2   :  { %v782_v16 = vsel %vm780_vm11, %v774_v58, %v781_v15  ;;  %vm1104_vm11 = vmand %vm1103_vm12, %vm3519_vm1 }
 0x1d3   :  { %783 = vst [vmem:[#allocation3 + $0x8] sm:$0xf] %v782_v16 }
 0x1d4   :  { %v877_v30 = vld [vmem:[#allocation3 + $0x10] sm:$0x11] }
 0x1d5   :  { %v2277_v39 = vcombine.high %v877_v30, %v877_v30  ;;  %v2276_v41 = vcombine.low %v877_v30, %v877_v30 }
 0x1da   :  { %v815_v18 = vld [vmem:[#allocation3 + $0x8] sm:$0xf] }
 0x1db   :  { %v816_v20 = vsel %vm814_vm4, %v808_v37, %v815_v18  ;;  %v1051_v37 = vld [vmem:[#allocation5] sm:$0x1]  ;;  %vm1133_vm4 = vcmask 1041152  }
 0x1dc   :  { %817 = vst [vmem:[#allocation3 + $0x8] sm:$0xf] %v816_v20 }
 0x1e3   :  { %v837_v21 = vld [vmem:[#allocation3 + $0x8] sm:$0xf] }
 0x1e4   :  { %v838_v14 = vsel %vm836_vm8, %v3147_v8, %v837_v21  ;;  %v2626_v8 = vld [vmem:[%s3476_s5 + $0x70] sm:$0xff]   ;;  %vm3520_vm8 = vmmov %vm3519_vm1 }
 0x1e5   :  { %839 = vst [vmem:[#allocation3 + $0x8] sm:$0xf] %v838_v14 }
 0x1ec   :  { %v864_v24 = vld [vmem:[#allocation3 + $0x8] sm:$0xf] }
 0x1ed   :  { %v865_v28 = vsel %vm863_vm14, %v857_v33, %v864_v24  ;;  %vm1134_vm14 = vmand %vm1133_vm4, %vm3520_vm8 }
 0x1ee   :  { %866 = vst [vmem:[#allocation3 + $0x8] sm:$0xf] %v865_v28 }
 0x1f5   :  { %v2609_v35 = vld [vmem:[#allocation3] ss:$8 sps:$4 sm:$0xff]  }
 0x1f6   :  { %1012 = vmatmul.mubr.bf16.vlgmr.msra.gmra.mrb[0].mxu1 %v2609_v35 }
 0x1f7   :  { %2288 = vmatprep.mubr.msk.bf16.mxu1 %vm972_vm15, %v2277_v39  ;;  %vm1272_vm15 = vmand %vm1078_vm6, %vm668_vm13  ;;  %vm2207_vm6 = vcmask 25616  }
 0x1fe   :  { %1020 = vmatmul.mubr.bf16.gmra.mrb[4].mxu1 %v2276_v41 }
 0x2c9   :  { %v1013_v42 = vpop.f32.mrb[0].mxu1 }
 0x2ca   :  { %v1014_v44 = vadd.f32 %v2273_v19, %v1013_v42  ;;  %v1015_v45 = vpop.f32.mrb[1].mxu1 }
 0x2cb   :  { %v1016_v46 = vpop.f32.mrb[2].mxu1 }
 0x2cc   :  { %v1027_v47 = vmax.f32 %v1014_v44, 0.0  ;;  %v1017_v48 = vadd.f32 %v2273_v19, %v1016_v46  ;;  %v1018_v53 = vpop.f32.mrb[3].mxu1 }
 0x2cd   :  { %v2615_v53 = vld [vmem:[%s3476_s5] sm:$0xff]  }
 0x2ce   :  { %v2395_v55 = vpack.c.bf16 %v1027_v47, %v1027_v47  ;;  %v1028_v31 = vmax.f32 %v1017_v48, 0.0  ;;  %2412 = vmatpush3.bf16.msra.mxu1 %v2615_v53 }
 0x2d0   :  { %1044 = vst.msk [vmem:[#allocation4] sm:$0xf] %vm1043_vm0, %v2395_v55  ;;  %v2396_v38 = vpack.c.bf16 %v1028_v31, %v1028_v31  ;;  %v2616_v55 = vld [vmem:[%s3476_s5 + $0x48] sm:$0xff]  }
 0x2d1   :  { %v1021_v57 = vpop.f32.mrb[4].mxu1  ;;  %v2617_v31 = vld [vmem:[%s3476_s5 + $0x8] sm:$0xff]   ;;  %2413 = vmatprep.subr.bf16.mxu1 %v2616_v55  ;;  %v2630_v55 = vld [vmem:[%s3476_s5 + $0x80] sm:$0xff]  }
 0x2d2   :  { %1045 = vst.msk [vmem:[#allocation4 + $0x4] sm:$0xf] %vm1043_vm0, %v2396_v38  ;;  %v1022_v6 = vadd.f32 %v2273_v19, %v1021_v57  ;;  %v1023_v59 = vpop.f32.mrb[5].mxu1  ;;  %2414 = vmatpush3.bf16.msra.mxu1 %v2617_v31  ;;  %v2618_v38 = vld [vmem:[%s3476_s5 + $0x50] sm:$0xff]   ;;  %v2620_v57 = vld [vmem:[%s3476_s5 + $0x58] sm:$0xff]   ;;  %vm1296_vm0 = vmand %vm1103_vm12, %vm668_vm13 }
 0x2d3   :  { %v1024_v58 = vpop.f32.mrb[6].mxu1  ;;  %2415 = vmatprep.subr.bf16.mxu1 %v2618_v38  ;;  %v2622_v59 = vld [vmem:[%s3476_s5 + $0x60] sm:$0xff]   ;;  %v2631_v38 = vld [vmem:[%s3476_s5 + $0x88] sm:$0xff]  }
 0x2d4   :  { %v1029_v5 = vmax.f32 %v1022_v6, 0.0  ;;  %v1025_v13 = vpop.f32.mrb[7].mxu1  ;;  %v2621_v6 = vld [vmem:[%s3476_s5 + $0x18] sm:$0xff]   ;;  %v2623_v58 = vld [vmem:[%s3476_s5 + $0x20] sm:$0xff]  }
 0x2d5   :  { %v2625_v13 = vld [vmem:[%s3476_s5 + $0x28] sm:$0xff]  }
 0x2d6   :  { %v2397_v63 = vpack.c.bf16 %v1029_v5, %v1029_v5  ;;  %2416 = vmatpush3.bf16.msra.mxu1 %v2619_v54  ;;  %v2624_v5 = vld [vmem:[%s3476_s5 + $0x68] sm:$0xff]  }
 0x2d7   :  { %v1048_v17 = vld [vmem:[#allocation4] sm:$0x1]  ;;  %v2297_v27 = vld.sshfl [vmem:[#allocation4] sm:$0x2 pattern:$0x75316420]  ;;  %2417 = vmatprep.subr.bf16.mxu1 %v2620_v57 }
 0x2d8   :  { %1047 = vst.msk [vmem:[#allocation4 + $0x8] sm:$0x1] %vm1046_vm3, %v2397_v63  ;;  %v1052_v29 = vsel %vm3188_vm7, %v1048_v17, %v1051_v37  ;;  %v1153_v23 = vrot.slane %v2297_v27, %v3184_v61  ;;  %v2292_v43 = vld.sshfl [vmem:[#allocation4] sm:$0x1 pattern:$0x75316420]  ;;  %vm1323_vm3 = vmand %vm1133_vm4, %vm668_vm13 }
 0x2d9   :  { %1053 = vst [vmem:[#allocation5] sm:$0x1] %v1052_v29  ;;  %v1069_v40 = vrot.slane %v2292_v43, %v3184_v61  ;;  %v1240_v7 = vld [vmem:[#allocation4 + $0x4] sm:$0x1]  ;;  %v2628_v63 = vld [vmem:[%s3476_s5 + $0x78] sm:$0xff]   ;;  %vm3521_vm13 = vmmov 0  }
 0x2da   :  { %v1154_v4 = vcombine.high %v1153_v23, %v1153_v23  ;;  %v2294_v9 = vld.sshfl [vmem:[#allocation4] sm:$0x10 pattern:$0x75316420]  ;;  %v1242_v33 = vsel %vm3188_vm7, %v1240_v7, %v1241_v26  ;;  %2418 = vmatpush3.bf16.msra.mxu1 %v2621_v6  ;;  %v2627_v37 = vld [vmem:[%s3476_s5 + $0x30] sm:$0xff]   ;;  %v2629_v17 = vld [vmem:[%s3476_s5 + $0x38] sm:$0xff]  }
 0x2db   :  { %v1071_v49 = vshrl.u32 %v1069_v40, 16  ;;  %v1092_v25 = vcombine.high %v2294_v9, %v2294_v9  ;;  %v2300_v32 = vld.sshfl [vmem:[#allocation4] sm:$0x20 pattern:$0x75316420]  ;;  %2419 = vmatprep.subr.bf16.mxu1 %v2622_v59 }
 0x2dc   :  { %v1157_v1 = vsel %vm3188_vm7, %v1154_v4, %v1156_v3  ;;  %1243 = vst [vmem:[#allocation5 + $0x2] sm:$0x1] %v1242_v33  ;;  %v1177_v2 = vshrl.u32 %v1154_v4, 16  ;;  %v1196_v22 = vcombine.high %v2300_v32, %v2300_v32  ;;  %v2634_v54 = vld [vmem:[%s3477_s7 + $0x4] ss:$8 sps:$4 sm:$0xff]   ;;  %vm1751_vm7 = vcmask 523264  }
 0x2dd   :  { %v2303_v60 = vld.sshfl [vmem:[#allocation4 + $0x4] sm:$0x10 pattern:$0x75316420]  ;;  %1158 = vst [vmem:[#allocation5 + $0x1] sm:$0x1] %v1157_v1  ;;  %1075 = vrot.lane.b32.xlu0 %v1071_v49, %s2675_s2  ;;  %v1099_v16 = vrot.slane %v1092_v25, %v3184_v61 }
 0x2de   :  { %v1258_v62 = vcombine.high %v2303_v60, %v2303_v60  ;;  %v2307_v34 = vld.sshfl [vmem:[#allocation4 + $0x4] sm:$0x20 pattern:$0x75316420]  ;;  %1181 = vrot.lane.b32.xlu1 %v1177_v2, %s2675_s2  ;;  %v1203_v11 = vrot.slane %v1196_v22, %v3184_v61  ;;  %2420 = vmatpush3.bf16.msra.mxu1 %v2623_v58  ;;  %v2637_v59 = vld [vmem:[%s3477_s7 + $0x14] ss:$8 sps:$4 sm:$0xff]  }
 0x2df   :  { %v1357_v12 = vcombine.high %v2307_v34, %v2307_v34  ;;  %v2306_v15 = vld.sshfl [vmem:[#allocation4 + $0x4] sm:$0x2 pattern:$0x75316420]  ;;  %v1424_v35 = vld [vmem:[#allocation4 + $0x8] sm:$0x1]  ;;  %2421 = vmatprep.subr.bf16.mxu1 %v2624_v5 }
 0x2e0   :  { %v1204_v18 = vcombine.high %v1203_v11, %v1203_v11  ;;  %v1265_v14 = vrot.slane %v1258_v62, %v3184_v61  ;;  %v2309_v24 = vld.sshfl [vmem:[#allocation4 + $0x8] sm:$0x1 pattern:$0x75316420]  ;;  %v1342_v28 = vrot.slane %v2306_v15, %v3184_v61  ;;  %v1126_v39 = vshrl.u32 %v1099_v16, 16 }
 0x2e1   :  { %v1364_v20 = vrot.slane %v1357_v12, %v3184_v61  ;;  %1100 = vrot.lane.b32.xlu0 %v1099_v16, %s2677_s21  ;;  %v1414_v44 = vrot.slane %v2309_v24, %v3184_v61  ;;  %v1080_v29 = vld [vmem:[#allocation5] sm:$0x1]  ;;  %v1244_v62 = vld [vmem:[#allocation4 + $0x4] sm:$0x1]  ;;  %v2640_v58 = vld [vmem:[%s3477_s7 + $0x24] ss:$8 sps:$4 sm:$0xff]  }
 0x2e2   :  { %1205 = vrot.lane.b32.xlu1 %v1204_v18, %s2677_s21  ;;  %v1230_v19 = vshrl.u32 %v1204_v18, 16  ;;  %v1267_v45 = vshll.u32 %v1265_v14, 16  ;;  %v3220_v46 = vcombine.high %v1342_v28, %v1342_v28  ;;  %2422 = vmatpush3.bf16.msra.mxu1 %v2625_v13  ;;  %v2635_v6 = vld [vmem:[%s3477_s7 + $0x10] ss:$8 sps:$4 sm:$0xff]   ;;  %v2638_v5 = vld [vmem:[%s3477_s7 + $0x20] ss:$8 sps:$4 sm:$0xff]  }
 0x2e3   :  { %v1365_v30 = vcombine.high %v1364_v20, %v1364_v20  ;;  %v1425_v36 = vld [vmem:[#allocation5 + $0x2] sm:$0x1]  ;;  %v1416_v48 = vshll.u32 %v1414_v44, 16  ;;  %2423 = vmatprep.subr.bf16.mxu1 %v2626_v8  ;;  %v2643_v13 = vld [vmem:[%s3477_s7 + $0x34] ss:$8 sps:$4 sm:$0xff]   ;;  %v2644_v8 = vld [vmem:[%s3478_s9 + $0x40] sm:$0xff]  }
 0x2e4   :  { %v1426_v41 = vsel %vm3208_vm2, %v1424_v35, %v1425_v36  ;;  %v1318_v50 = vshll.u32 %v3220_v46, 16  ;;  %v1184_v26 = vld [vmem:[#allocation5 + $0x1] sm:$0x1]  ;;  %2436 = vmatprep.subr.bf16.mxu0 %v2644_v8  ;;  %v2684_v8 = vmov 64  }
 0x2e5   :  { %v1367_v42 = vshll.u32 %v1365_v30, 16  ;;  %1427 = vst [vmem:[#allocation5 + $0x2] sm:$0x1] %v1426_v41  ;;  %1130 = vrot.lane.b32.xlu0 %v1126_v39, %s2678_s22 }
 0x2e6   :  { %1234 = vrot.lane.b32.xlu1 %v1230_v19, %s2678_s22  ;;  %v2579_v51 = vpack.i.bf16 %v1416_v48, %v1318_v50  ;;  %2424 = vmatpush3.bf16.msra.mxu1 %v2627_v37  ;;  %v2645_v37 = vld [vmem:[%s3478_s9] sm:$0xff]  }
 0x2e7   :  { %v2574_v47 = vpack.i.bf16 %v1367_v42, %v1267_v45  ;;  %2425 = vmatprep.subr.bf16.mxu1 %v2628_v63  ;;  %v2646_v63 = vld [vmem:[%s3478_s9 + $0x48] sm:$0xff]   ;;  %2437 = vmatpush3.bf16.msra.mxu0 %v2645_v37  ;;  %v2668_v37 = vld [vmem:[%s3483_s14] sm:$0xff]  }
 0x2e8   :  { %2438 = vmatprep.subr.bf16.mxu0 %v2646_v63  ;;  %2584 = vset.pattern.permute.xlu0 %v2684_v8  ;;  %v2669_v63 = vld [vmem:[%s3483_s14 + $0x8] sm:$0xff]  }
 0x2e9   :  { %2575 = vrot.lane.b32.xlu0 %v2574_v47, %s2675_s2 }
 0x2ea   :  { %1293 = vrot.lane.b32.xlu1 %v1265_v14, %s2677_s21  ;;  %2426 = vmatpush3.bf16.msra.mxu1 %v2629_v17  ;;  %v2647_v17 = vld [vmem:[%s3478_s9 + $0x8] sm:$0xff]  }
 0x2eb   :  { %2520 = vmatprep.subr.bf16.mxu1 %v2672_v0  ;;  %2439 = vmatpush3.bf16.msra.mxu0 %v2647_v17  ;;  %v2357_v17 = vld [vmem:[%s3484_s12] ss:$0 sm:$0xff] }
 0x2ed   :  { %1393 = vrot.lane.b32.xlu0 %v1365_v30, %s2677_s21 }
 0x2ee   :  { %2580 = vrot.lane.b32.xlu1 %v2579_v51, %s2678_s22 }
 0x34f   :  { %v1076_v27 = vpop.permute.xlu0 %1075 }
 0x350   :  { %v1081_v23 = vsel %vm1079_vm5, %v1076_v27, %v1080_v29  ;;  %v1182_v43 = vpop.permute.xlu1 %1181  ;;  %v2648_v27 = vld [vmem:[%s3478_s9 + $0x50] sm:$0xff]  }
 0x351   :  { %1082 = vst [vmem:[#allocation5] sm:$0x1] %v1081_v23  ;;  %v1185_v3 = vsel %vm1079_vm5, %v1182_v43, %v1184_v26  ;;  %v2649_v29 = vld [vmem:[%s3478_s9 + $0x10] sm:$0xff]   ;;  %2440 = vmatprep.subr.bf16.mxu0 %v2648_v27  ;;  %v2650_v23 = vld [vmem:[%s3478_s9 + $0x58] sm:$0xff]   ;;  %v2652_v43 = vld [vmem:[%s3478_s9 + $0x60] sm:$0xff]  }
 0x352   :  { %1186 = vst [vmem:[#allocation5 + $0x1] sm:$0x1] %v1185_v3  ;;  %2441 = vmatpush3.bf16.msra.mxu0 %v2649_v29  ;;  %v2651_v26 = vld [vmem:[%s3478_s9 + $0x18] sm:$0xff]   ;;  %v2653_v3 = vld [vmem:[%s3478_s9 + $0x20] sm:$0xff]  }
 0x353   :  { %v1101_v40 = vpop.permute.xlu0 %1100  ;;  %2442 = vmatprep.subr.bf16.mxu0 %v2650_v23 }
 0x354   :  { %v1206_v33 = vpop.permute.xlu1 %1205 }
 0x356   :  { %2443 = vmatpush3.bf16.msra.mxu0 %v2651_v26 }
 0x357   :  { %v1131_v25 = vpop.permute.xlu0 %1130  ;;  %2444 = vmatprep.subr.bf16.mxu0 %v2652_v43 }
 0x358   :  { %v1105_v4 = vld [vmem:[#allocation5] sm:$0x1]  ;;  %v1235_v22 = vpop.permute.xlu1 %1234 }
 0x359   :  { %v1106_v7 = vsel %vm1104_vm11, %v1101_v40, %v1105_v4  ;;  %v1208_v9 = vld [vmem:[#allocation5 + $0x1] sm:$0x1]  ;;  %v2654_v40 = vld [vmem:[%s3478_s9 + $0x68] sm:$0xff]  }
 0x35a   :  { %1107 = vst [vmem:[#allocation5] sm:$0x1] %v1106_v7  ;;  %v1209_v49 = vsel %vm1104_vm11, %v1206_v33, %v1208_v9  ;;  %2445 = vmatpush3.bf16.msra.mxu0 %v2653_v3  ;;  %v2655_v4 = vld [vmem:[%s3478_s9 + $0x28] sm:$0xff]   ;;  %v2656_v7 = vld [vmem:[%s3478_s9 + $0x70] sm:$0xff]   ;;  %v2658_v33 = vld [vmem:[%s3478_s9 + $0x78] sm:$0xff]  }
 0x35b   :  { %1210 = vst [vmem:[#allocation5 + $0x1] sm:$0x1] %v1209_v49  ;;  %v2576_v16 = vpop.permute.xlu0 %2575  ;;  %2446 = vmatprep.subr.bf16.mxu0 %v2654_v40  ;;  %v2657_v9 = vld [vmem:[%s3478_s9 + $0x30] sm:$0xff]   ;;  %v2659_v49 = vld [vmem:[%s3478_s9 + $0x38] sm:$0xff]  }
 0x35c   :  { %v2577_v18 = vunpack.i.l.bf16 %v2576_v16  ;;  %v2578_v20 = vunpack.i.h.bf16 %v2576_v16  ;;  %v1294_v35 = vpop.permute.xlu1 %1293 }
 0x35e   :  { %2447 = vmatpush3.bf16.msra.mxu0 %v2655_v4  ;;  %v2670_v4 = vld [vmem:[%s3483_s14 + $0x10] sm:$0xff]  }
 0x35f   :  { %v1394_v39 = vpop.permute.xlu0 %1393  ;;  %2448 = vmatprep.subr.bf16.mxu0 %v2656_v7  ;;  %v2671_v7 = vld [vmem:[%s3483_s14 + $0x18] sm:$0xff]  }
 0x360   :  { %v2581_v42 = vpop.permute.xlu1 %2580 }
 0x361   :  { %v1135_v32 = vld [vmem:[#allocation5] sm:$0x1]  ;;  %v2582_v44 = vunpack.i.l.bf16 %v2581_v42 }
 0x362   :  { %v1136_v1 = vsel %vm1134_vm14, %v1131_v25, %v1135_v32  ;;  %v1237_v2 = vld [vmem:[#allocation5 + $0x1] sm:$0x1]  ;;  %2449 = vmatpush3.bf16.msra.mxu0 %v2657_v9  ;;  %v2366_v9 = vld [vmem:[%s3486_s13] ss:$0 sm:$0xff] }
 0x363   :  { %1137 = vst [vmem:[#allocation5] sm:$0x1] %v1136_v1  ;;  %v1238_v60 = vsel %vm1134_vm14, %v1235_v22, %v1237_v2  ;;  %2450 = vmatprep.subr.bf16.mxu0 %v2658_v33  ;;  %v2367_v33 = vld [vmem:[%s3486_s13 + $0x1] ss:$0 sm:$0xff] }
 0x364   :  { %1239 = vst [vmem:[#allocation5 + $0x1] sm:$0x1] %v1238_v60  ;;  %v2310_v60 = vld [vmem:[%s3479_s6] ss:$0 sm:$0xff] }
 0x366   :  { %2451 = vmatpush3.bf16.msra.mxu0 %v2659_v49 }
 0x367   :  { %2548 = vmatprep.subr.bf16.mxu0 %v2672_v0 }
 0x36a   :  { %v1246_v34 = vld [vmem:[#allocation5] sm:$0x1] }
 0x36b   :  { %v1247_v11 = vsel %vm3208_vm2, %v1244_v62, %v1246_v34  ;;  %v1345_v12 = vld [vmem:[#allocation5 + $0x1] sm:$0x1] }
 0x36c   :  { %1248 = vst [vmem:[#allocation5] sm:$0x1] %v1247_v11  ;;  %v1346_v15 = vsel %vm3208_vm2, %v3220_v46, %v1345_v12  ;;  %v2583_v46 = vunpack.i.h.bf16 %v2581_v42  ;;  %vm2201_vm2 = vcmask 9216  }
 0x36d   :  { %1347 = vst [vmem:[#allocation5 + $0x1] sm:$0x1] %v1346_v15 }
 0x373   :  { %v1273_v14 = vld [vmem:[#allocation5] sm:$0x1] }
 0x374   :  { %v1274_v24 = vsel %vm1272_vm15, %v2577_v18, %v1273_v14  ;;  %v1372_v28 = vld [vmem:[#allocation5 + $0x1] sm:$0x1]  ;;  %v2660_v14 = vld [vmem:[%s3480_s11] sm:$0xff]  }
 0x375   :  { %1275 = vst [vmem:[#allocation5] sm:$0x1] %v1274_v24  ;;  %v1373_v30 = vsel %vm1272_vm15, %v2578_v20, %v1372_v28  ;;  %v2661_v24 = vld [vmem:[%s3480_s11 + $0x8] sm:$0xff]   ;;  %v2662_v28 = vld [vmem:[%s3480_s11 + $0x10] sm:$0xff]  }
 0x376   :  { %1374 = vst [vmem:[#allocation5 + $0x1] sm:$0x1] %v1373_v30  ;;  %v2663_v30 = vld [vmem:[%s3480_s11 + $0x18] sm:$0xff]  }
 0x37c   :  { %v1297_v36 = vld [vmem:[#allocation5] sm:$0x1] }
 0x37d   :  { %v1298_v21 = vsel %vm1296_vm0, %v1294_v35, %v1297_v36  ;;  %v1396_v41 = vld [vmem:[#allocation5 + $0x1] sm:$0x1]  ;;  %v2664_v35 = vld [vmem:[%s3480_s11 + $0x20] sm:$0xff]   ;;  %v2665_v36 = vld [vmem:[%s3480_s11 + $0x28] sm:$0xff]  }
 0x37e   :  { %1299 = vst [vmem:[#allocation5] sm:$0x1] %v1298_v21  ;;  %v1397_v19 = vsel %vm1296_vm0, %v1394_v39, %v1396_v41  ;;  %v1703_v21 = vsub.s32 0, %v3181_v56  ;;  %v1699_v39 = vld [vmem:[%s3481_s8] sm:$0x3]  ;;  %v1707_v41 = vsub.s32 1, %v3181_v56 }
 0x37f   :  { %1398 = vst [vmem:[#allocation5 + $0x1] sm:$0x1] %v1397_v19  ;;  %v2666_v56 = vld [vmem:[%s3480_s11 + $0x30] sm:$0xff]  }
 0x380   :  { %v1704_v19 = vrot.slane %v1699_v39, %v1703_v21  ;;  %v1708_v42 = vrot.slane %v1699_v39, %v1707_v41 }
 0x385   :  { %v1324_v45 = vld [vmem:[#allocation5] sm:$0x1] }
 0x386   :  { %v1421_v47 = vld [vmem:[#allocation5 + $0x1] sm:$0x1]  ;;  %v1325_v48 = vsel %vm1323_vm3, %v2582_v44, %v1324_v45 }
 0x387   :  { %v1422_v50 = vsel %vm1323_vm3, %v2583_v46, %v1421_v47  ;;  %1326 = vst [vmem:[#allocation5] sm:$0x1] %v1325_v48 }
 0x388   :  { %1423 = vst [vmem:[#allocation5 + $0x1] sm:$0x1] %v1422_v50 }
 0x38f   :  { %v2311_v51 = vld.sshfl [vmem:[#allocation5] sm:$0x13 pattern:$0x75316420] }
 0x390   :  { %v1480_v52 = vcombine.high %v2311_v51, %v2311_v51  ;;  %v1487_v31 = vrot.slane %v2311_v51, %v3184_v61 }
 0x392   :  { %v1494_v53 = vrot.slane %v1480_v52, %v3184_v61  ;;  %v2632_v61 = vld [vmem:[%s3477_s7] ss:$8 sps:$4 sm:$0xff]   ;;  %v1495_v57 = vcombine.high %v1487_v31, %v1487_v31 }
 0x394   :  { %1641 = vmatprep.mubr.bf16.mxu1 %v1494_v53 }
 0x395   :  { %1642 = vmatmul.mubr.bf16.vlgmr.msra.gmra.mrb[8].mxu1 %v1487_v31  ;;  %v2667_v31 = vld [vmem:[%s3480_s11 + $0x38] sm:$0xff]  }
 0x396   :  { %2521 = vmatpush3.bf16.msra.mxu1 %v2630_v55  ;;  %2524 = vmatprep.mubr.msk.bf16.mxu1 %vm3521_vm13, %v2672_v0 }
 0x397   :  { %2522 = vmatprep.subr.bf16.mxu1 %v2672_v0 }
 0x39a   :  { %2523 = vmatpush3.bf16.msra.mxu1 %v2631_v38 }
 0x39b   :  { %1755 = vmatprep.subr.bf16.mxu1 %v2634_v54  ;;  %v2340_v54 = vld [vmem:[%s3482_s10] ss:$0 sm:$0xff] }
 0x39d   :  { %2525 = vmatmul.mubr.msk.bf16.vlgmr.msra.gmra.mrb[12].mxu1 %vm3522_vm10, %v1495_v57 }
 0x39e   :  { %1756 = vmatpush1.bf16.msra.mxu1 %v2632_v61  ;;  %1787 = vmatprep.mubr.bf16.mxu1 %v2681_v10  ;;  %v2641_v10 = vld [vmem:[%s3477_s7 + $0x30] ss:$8 sps:$4 sm:$0xff]  }
 0x39f   :  { %1757 = vmatprep.subr.bf16.mxu1 %v2637_v59 }
 0x3a2   :  { %1758 = vmatpush1.bf16.msra.mxu1 %v2635_v6 }
 0x3a3   :  { %1759 = vmatprep.subr.bf16.mxu1 %v2640_v58 }
 0x3a6   :  { %1760 = vmatpush1.bf16.msra.mxu1 %v2638_v5 }
 0x3a7   :  { %1761 = vmatprep.subr.bf16.mxu1 %v2643_v13  ;;  %v2683_v13 = vmov 65  }
 0x3a8   :  { %2585 = vset.pattern.permute.xlu1 %v2683_v13 }
 0x3aa   :  { %1762 = vmatpush1.bf16.msra.mxu1 %v2641_v10 }
 0x3ab   :  { %2528 = vmatprep.subr.bf16.mxu1 %v2672_v0 }
 0x468   :  { %v2427_v25 = vpop.f32.mrb[8].mxu1 }
 0x469   :  { %v2428_v32 = vpop.f32.mrb[9].mxu1 }
 0x46a   :  { %v2429_v1 = vadd.f32 %v2428_v32, %v2427_v25  ;;  %v2430_v2 = vpop.f32.mrb[10].mxu1 }
 0x46b   :  { %v2431_v22 = vpop.f32.mrb[11].mxu1 }
 0x46c   :  { %v1644_v62 = vadd.f32 %v2429_v1, %v2310_v60 }
 0x470   :  { %v1683_v34 = vpop.f32.mrb[12].mxu1 }
 0x471   :  { %v1684_v11 = vadd.f32 %v1683_v34, %v1644_v62  ;;  %v2526_v12 = vpop.f32.mrb[13].mxu1 }
 0x472   :  { %v1686_v15 = vpop.f32.mrb[14].mxu1 }
 0x473   :  { %v1689_v16 = vmax.f32 %v1684_v11, 0.0  ;;  %v2527_v18 = vpop.f32.mrb[15].mxu1  ;;  %v2368_v11 = vld [vmem:[%s3487_s15] ss:$0 sm:$0xff] }
 0x475   :  { %v1690_v20 = vpack.c.bf16 %v1689_v16, %v1689_v16 }
 0x477   :  { %2339 = vmatmul.mubr.msk.bf16.vlgmr.msra.gmra.mrb[16].mxu1 %vm1751_vm7, %v1690_v20 }
 0x478   :  { %2544 = vmatprep.mubr.msk.bf16.mxu1 %vm3521_vm13, %v2672_v0  ;;  %2529 = vmatpush3.bf16.msra.mxu1 %v2660_v14 }
 0x479   :  { %2530 = vmatprep.subr.bf16.mxu1 %v2672_v0 }
 0x47c   :  { %2531 = vmatpush3.bf16.msra.mxu1 %v2661_v24 }
 0x47d   :  { %2532 = vmatprep.subr.bf16.mxu1 %v2672_v0 }
 0x480   :  { %2533 = vmatpush3.bf16.msra.mxu1 %v2662_v28 }
 0x481   :  { %2534 = vmatprep.subr.bf16.mxu1 %v2672_v0 }
 0x484   :  { %2535 = vmatpush3.bf16.msra.mxu1 %v2663_v30 }
 0x485   :  { %2536 = vmatprep.subr.bf16.mxu1 %v2672_v0 }
 0x488   :  { %2537 = vmatpush3.bf16.msra.mxu1 %v2664_v35 }
 0x489   :  { %2538 = vmatprep.subr.bf16.mxu1 %v2672_v0 }
 0x48c   :  { %2539 = vmatpush3.bf16.msra.mxu1 %v2665_v36 }
 0x48d   :  { %2540 = vmatprep.subr.bf16.mxu1 %v2672_v0 }
 0x490   :  { %2541 = vmatpush3.bf16.msra.mxu1 %v2666_v56 }
 0x491   :  { %2542 = vmatprep.subr.bf16.mxu1 %v2672_v0 }
 0x494   :  { %2543 = vmatpush3.bf16.msra.mxu1 %v2667_v31 }
 0x54a   :  { %v1789_v44 = vpop.f32.mrb[16].mxu1 }
 0x54b   :  { %v1790_v45 = vadd.f32 %v1789_v44, %v1704_v19  ;;  %v1791_v46 = vpop.f32.mrb[17].mxu1 }
 0x54c   :  { %v1792_v47 = vadd.f32 %v1791_v46, %v1708_v42  ;;  %v1793_v48 = vpop.f32.mrb[18].mxu1 }
 0x54d   :  { %v1796_v50 = vmax.f32 %v1790_v45, 0.0  ;;  %v1794_v51 = vpop.f32.mrb[19].mxu1 }
 0x54e   :  { %v1797_v52 = vmax.f32 %v1792_v47, 0.0 }
 0x54f   :  { %v1798_v55 = vpack.c.bf16 %v1796_v50, %v1796_v50 }
 0x550   :  { %v1799_v53 = vpack.c.bf16 %v1797_v52, %v1797_v52 }
 0x552   :  { %1967 = vmatprep.mubr.bf16.mxu0 %v1799_v53 }
 0x553   :  { %1968 = vmatmul.mubr.bf16.vlgmr.msra.gmra.mrb[44].mxu0 %v1798_v55 }
 0x554   :  { %2556 = vmatprep.mubr.msk.bf16.mxu0 %vm3521_vm13, %v2672_v0  ;;  %2549 = vmatpush3.bf16.msra.mxu0 %v2668_v37 }
 0x555   :  { %2550 = vmatprep.subr.bf16.mxu0 %v2672_v0 }
 0x558   :  { %2551 = vmatpush3.bf16.msra.mxu0 %v2669_v63 }
 0x559   :  { %2552 = vmatprep.subr.bf16.mxu0 %v2672_v0 }
 0x55c   :  { %2553 = vmatpush3.bf16.msra.mxu0 %v2670_v4 }
 0x55d   :  { %2554 = vmatprep.subr.bf16.mxu0 %v2672_v0 }
 0x560   :  { %2555 = vmatpush3.bf16.msra.mxu0 %v2671_v7 }
 0x626   :  { %v2452_v38 = vpop.f32.mrb[44].mxu0 }
 0x627   :  { %v2453_v61 = vpop.f32.mrb[45].mxu0 }
 0x628   :  { %v2454_v57 = vadd.f32 %v2453_v61, %v2452_v38  ;;  %v2455_v6 = vpop.f32.mrb[46].mxu0 }
 0x629   :  { %v2456_v59 = vpop.f32.mrb[47].mxu0 }
 0x62a   :  { %v1970_v58 = vadd.f32 %v2454_v57, %v2340_v54 }
 0x62c   :  { %v1975_v5 = vmax.f32 %v1970_v58, 0.0 }
 0x62e   :  { %v1976_v10 = vpack.c.bf16 %v1975_v5, %v1975_v5 }
 0x630   :  { %2545 = vmatmul.mubr.bf16.vlgmr.msra.gmra.mrb[20].mxu1 %v1976_v10 }
 0x703   :  { %v2082_v27 = vpop.f32.mrb[20].mxu1 }
 0x704   :  { %v2083_v29 = vadd.f32 %v2357_v17, %v2082_v27  ;;  %v2546_v23 = vpop.f32.mrb[21].mxu1 }
 0x705   :  { %v2085_v26 = vpop.f32.mrb[22].mxu1 }
 0x706   :  { %2104 = vperm.xlu1 %2585, %v2083_v29   ;;  %2093 = vperm.xlu0 %2584, %v2083_v29   ;;  %v2547_v43 = vpop.f32.mrb[23].mxu1  ;;  %v2088_v3 = vmax.f32 %v2083_v29, -20.0 }
 0x708   :  { %v2089_v40 = vmin.f32 %v2088_v3, 2.0 }
 0x70a   :  { %2198 = vrot.lane.b32.xlu1 %v2083_v29, %s2677_s21  ;;  %2204 = vrot.lane.b32.xlu0 %v2089_v40, %s2677_s21 }
 0x70b   :  { %2586 = vset.pattern.permute.xlu0 %v2683_v13 }
 0x785   :  { %v2105_v49 = vpop.permute.xlu1 %2104  ;;  %v2094_v25 = vpop.permute.xlu0 %2093 }
 0x786   :  { %v2100_v32 = vmul.f32 %v2366_v9, %v2094_v25  ;;  %v2111_v1 = vmul.f32 %v2367_v33, %v2105_v49 }
 0x788   :  { %v2101_v2 = vadd.f32 %v2100_v32, %v2083_v29 }
 0x789   :  { %v2199_v0 = vpop.permute.xlu1 %2198  ;;  %v2205_v22 = vpop.permute.xlu0 %2204 }
 0x78a   :  { %v2112_v60 = vadd.f32 %v2111_v1, %v2101_v2  ;;  %2202 = vst.msk [vmem:[%s3485_s16] sm:$0x3] %vm2201_vm2, %v2199_v0 }
 0x78b   :  { %2208 = vst.msk [vmem:[%s3485_s16] sm:$0x3] %vm2207_vm6, %v2205_v22 }
 0x78c   :  { %v2113_v62 = vmax.f32 %v2112_v60, 0.0 }
 0x78e   :  { %v2114_v34 = vpack.c.bf16 %v2113_v62, %v2113_v62 }
 0x790   :  { %2557 = vmatmul.mubr.msk.bf16.vlgmr.msra.gmra.mrb[48].mxu0 %vm1751_vm7, %v2114_v34 }
 0x863   :  { %v2191_v12 = vpop.f32.mrb[48].mxu0 }
 0x864   :  { %v2192_v15 = vadd.f32 %v2368_v11, %v2191_v12  ;;  %v2558_v16 = vpop.f32.mrb[49].mxu0 }
 0x865   :  { %v2194_v18 = vpop.f32.mrb[50].mxu0 }
 0x866   :  { %2210 = vrot.lane.b32.xlu1 %v2192_v15, %s2685_s1  ;;  %v2559_v20 = vpop.f32.mrb[51].mxu0 }
 0x8d8   :  { %v2211_v14 = vpop.permute.xlu1 %2210 }
 0x8d9   :  { %2214 = vst.msk [vmem:[%s3485_s16] sm:$0x3] %vm2213_vm9, %v2211_v14 }

</bundles_post_ra>
